<compile_context>
chip_gen: v6e
topology: v6e:2x2x1
jax: 0.10.0
libtpu: 0.0.40
codegen_flags: <defaults>
</compile_context>

<pallas_src>
import math
import functools

import jax
import jax.numpy as jnp
from jax.experimental import pallas as pl
from jax.experimental.pallas import tpu as pltpu

N_LAYERS = 2
N_HEADS = 4
DTYPE = jnp.float32          # stands in for clip_model.dtype (activation / param storage)
MATMUL_DTYPE = jnp.bfloat16  # MXU operand dtype (f32 accumulation everywhere)


# ----------------------------------------------------------------------------- helpers
def _layernorm(v, w, b, eps=1e-5):
    mu = jnp.mean(v, axis=-1, keepdims=True)
    var = jnp.mean((v - mu) ** 2, axis=-1, keepdims=True)
    return (v - mu) * jax.lax.rsqrt(var + eps) * w + b


def _round_up(x, m):
    return ((x + m - 1) // m) * m


def _pick_vmem_limit():
    # Re-derive the scoped-VMEM ceiling per generation (v7x: 64 MiB physical,
    # v5e/v6e: 128 MiB).  Leave ~25% headroom, cap at 96 MiB, floor at 32 MiB.
    phys = 64 * 1024 * 1024
    try:
        phys = int(pltpu.get_tpu_info().vmem_capacity_bytes)
    except Exception:
        pass
    return int(min(max(phys * 3 // 4, 32 * 1024 * 1024), 96 * 1024 * 1024))


# ----------------------------------------------------------------------------- kernel
def text_encoder_kernel(x_ref, pos_ref, eot_ref, bias_ref,
                        ln1w, ln1b, wqkv, bqkv, wo, bo,
                        ln2w, ln2b, wfc, bfc, wpr, bpr,
                        lnfw, lnfb, proj,
                        o_ref, x_scr, attn_scr, *, n_heads, tile_n, lp):
    li = pl.program_id(1)                                    # layer axis (inner, "arbitrary")
    d = x_scr.shape[-1]
    m = tile_n * lp
    dh = d // n_heads
    scale = 1.0 / math.sqrt(dh)

    # --- layer 0: fused positional add; activation becomes VMEM-resident for this tile
    @pl.when(li == 0)
    def _init():
        x0 = x_ref[...].astype(jnp.float32) + pos_ref[...].astype(jnp.float32)
        x_scr[...] = x0.reshape(m, d)                        # Lp % 8 == 0 -> pure view

    x = x_scr[...]                                           # (M_tile, D) f32

    # --- causal multi-head self-attention (pre-LN) ---
    h = _layernorm(x, ln1w[0], ln1b[0])
    qkv = jnp.dot(h.astype(MATMUL_DTYPE), wqkv[0],
                  preferred_element_type=jnp.float32) + bqkv[0]      # (M, 3D) f32
    qkv3 = qkv.reshape(tile_n, lp, 3 * d)                    # pure view (Lp % 8 == 0)

    # Precomputed additive causal bias (0 / -1e30), hoisted broadcast (once per layer).
    bias = jnp.broadcast_to(bias_ref[...], (tile_n, lp, lp))

    # Small static head loop; each head's output is written straight into attn_scr at
    # its column offset (no concatenate / relayout).  At real CLIP sizes (dh=64) heads
    # could be grouped so column offsets land on 128-lane boundaries.
    for hi in range(n_heads):
        q_h = qkv3[:, :, hi * dh:(hi + 1) * dh] * scale      # scale folded into narrow q
        k_h = qkv3[:, :, d + hi * dh:d + (hi + 1) * dh]
        v_h = qkv3[:, :, 2 * d + hi * dh:2 * d + (hi + 1) * dh]
        s = jnp.einsum('nqd,nkd->nqk',
                       q_h.astype(MATMUL_DTYPE), k_h.astype(MATMUL_DTYPE),
                       preferred_element_type=jnp.float32) + bias
        s_max = jnp.max(s, axis=-1, keepdims=True)
        e = jnp.exp(s - s_max)
        p = e * pl.reciprocal(jnp.sum(e, axis=-1, keepdims=True), approx=True)
        o_h = jnp.einsum('nqk,nkd->nqd',
                         p.astype(MATMUL_DTYPE), v_h.astype(MATMUL_DTYPE),
                         preferred_element_type=jnp.float32)
        attn_scr[:, hi * dh:(hi + 1) * dh] = o_h.reshape(m, dh)

    attn = jnp.dot(attn_scr[...].astype(MATMUL_DTYPE), wo[0],
                   preferred_element_type=jnp.float32) + bo[0]
    x = x + attn

    # --- MLP with QuickGELU (x * sigmoid(1.702 x)) ---
    h2 = _layernorm(x, ln2w[0], ln2b[0])
    f = jnp.dot(h2.astype(MATMUL_DTYPE), wfc[0],
                preferred_element_type=jnp.float32) + bfc[0]
    f = f * jax.nn.sigmoid(1.702 * f)
    f = jnp.dot(f.astype(MATMUL_DTYPE), wpr[0],
                preferred_element_type=jnp.float32) + bpr[0]
    x = x + f

    x_scr[...] = x

    # --- last layer: ln_final + per-tile EOT gather + text projection ---
    @pl.when(li == pl.num_programs(1) - 1)
    def _final():
        # One-hot row gather bounded by the tile: O(TILE_N * M_tile * D), a few KiB.
        seq = jax.lax.broadcasted_iota(jnp.int32, (tile_n, 1), 0)
        tgt = seq * lp + eot_ref[...]                        # flat row index within tile
        cols = jax.lax.broadcasted_iota(jnp.int32, (tile_n, m), 1)
        onehot = (cols == tgt).astype(jnp.float32)
        g = jnp.dot(onehot, x, preferred_element_type=jnp.float32)   # exact row gather
        g = _layernorm(g, lnfw[...], lnfb[...])
        o_ref[...] = jnp.dot(g.astype(MATMUL_DTYPE), proj[...],
                             preferred_element_type=jnp.float32).astype(o_ref.dtype)


# ----------------------------------------------------------------------------- wrapper
def text_encoder_forward(prompts, tokenized_prompts, pos_emb, layer_params,
                         lnf_w, lnf_b, text_projection):
    N, L, D = prompts.shape
    E = text_projection.shape[1]
    n_layers = len(layer_params)

    # Pad L to a multiple of 8 so (M, D) <-> (N, Lp, D) reshapes are free views.
    Lp = _round_up(L, 8)

    # Sequence tile: >= 256 rows per step fills the 256x256 MXU (v6e/v7x); rounded to a
    # multiple of 8 (when N >= 8) so every per-tile block stays (8, *)-aligned.
    tile_n = max(1, -(-256 // Lp))
    if N >= 8:
        tile_n = min(_round_up(tile_n, 8), _round_up(N, 8))
    else:
        tile_n = N
    n_tiles = -(-N // tile_n)
    Np = n_tiles * tile_n

    # glue: EOT index = argmax over token ids (tiny integer reduction, not a hot path)
    eot = jnp.argmax(tokenized_prompts, axis=-1).astype(jnp.int32).reshape(N, 1)

    prompts_p = jnp.pad(prompts.astype(jnp.float32),
                        ((0, Np - N), (0, Lp - L), (0, 0)))
    pos_p = jnp.pad(pos_emb.astype(jnp.float32), ((0, Lp - L), (0, 0)))
    eot_p = jnp.pad(eot, ((0, Np - N), (0, 0)))

    # Additive causal bias (0 on/below diagonal, -1e30 above).  Padded key positions
    # (indices >= L) are strictly "future" for every real query, so they are masked too.
    rows = jnp.arange(Lp)[:, None]
    cols = jnp.arange(Lp)[None, :]
    causal_bias = jnp.where(cols <= rows, 0.0, -1e30).astype(jnp.float32)

    def stack(i):
        return jnp.stack([p[i] for p in layer_params])

    ln1w = stack(0).reshape(n_layers, 1, D)
    ln1b = stack(1).reshape(n_layers, 1, D)
    wqkv = stack(2).astype(MATMUL_DTYPE)                  # (Lyr, D, 3D)
    bqkv = stack(3).reshape(n_layers, 1, 3 * D)
    wo = stack(4).astype(MATMUL_DTYPE)                    # (Lyr, D, D)
    bo = stack(5).reshape(n_layers, 1, D)
    ln2w = stack(6).reshape(n_layers, 1, D)
    ln2b = stack(7).reshape(n_layers, 1, D)
    wfc = stack(8).astype(MATMUL_DTYPE)                   # (Lyr, D, 4D)
    bfc = stack(9).reshape(n_layers, 1, 4 * D)
    wpr = stack(10).astype(MATMUL_DTYPE)                  # (Lyr, 4D, D)
    bpr = stack(11).reshape(n_layers, 1, D)

    lnfw = lnf_w.reshape(1, D)
    lnfb = lnf_b.reshape(1, D)
    proj = text_projection.astype(MATMUL_DTYPE)

    def const_spec(arr):
        nd = arr.ndim
        return pl.BlockSpec(arr.shape, lambda ti, li, _nd=nd: (0,) * _nd)

    def layer_spec(arr):
        return pl.BlockSpec((1,) + arr.shape[1:], lambda ti, li: (li, 0, 0))

    in_specs = (
        [pl.BlockSpec((tile_n, Lp, D), lambda ti, li: (ti, 0, 0)),   # prompts (per tile)
         const_spec(pos_p),                                          # positional embedding
         pl.BlockSpec((tile_n, 1), lambda ti, li: (ti, 0)),          # EOT indices (per tile)
         const_spec(causal_bias)]
        + [layer_spec(w) for w in (ln1w, ln1b, wqkv, bqkv, wo, bo,
                                   ln2w, ln2b, wfc, bfc, wpr, bpr)]
        + [const_spec(lnfw), const_spec(lnfb), const_spec(proj)]
    )

    out = pl.pallas_call(
        functools.partial(text_encoder_kernel, n_heads=N_HEADS, tile_n=tile_n, lp=Lp),
        out_shape=jax.ShapeDtypeStruct((Np, E), prompts.dtype),
        grid=(n_tiles, n_layers),
        in_specs=in_specs,
        out_specs=pl.BlockSpec((tile_n, E), lambda ti, li: (ti, 0)),
        scratch_shapes=[pltpu.VMEM((tile_n * Lp, D), jnp.float32),   # residual stream
                        pltpu.VMEM((tile_n * Lp, D), jnp.float32)],  # attention output
        compiler_params=pltpu.CompilerParams(
            # tiles are independent -> parallel (v7x megacore); layers sequential.
            dimension_semantics=("parallel", "arbitrary"),
            vmem_limit_bytes=_pick_vmem_limit(),
        ),
    )(prompts_p, pos_p, eot_p, causal_bias,
      ln1w, ln1b, wqkv, bqkv, wo, bo, ln2w, ln2b, wfc, bfc, wpr, bpr,
      lnfw, lnfb, proj)

    return out[:N]


# ----------------------------------------------------------------------------- reference
def _ref_block(x, p, n_heads):
    ln1w, ln1b, wqkv, bqkv, wo, bo, ln2w, ln2b, wfc, bfc, wpr, bpr = p
    N, L, D = x.shape
    dh = D // n_heads
    h = _layernorm(x, ln1w, ln1b)
    qkv = h @ wqkv + bqkv
    q, k, v = qkv[..., :D], qkv[..., D:2 * D], qkv[..., 2 * D:]
    q = q.reshape(N, L, n_heads, dh)
    k = k.reshape(N, L, n_heads, dh)
    v = v.reshape(N, L, n_heads, dh)
    s = jnp.einsum('nqhd,nkhd->nhqk', q, k) / math.sqrt(dh)
    mask = jnp.tril(jnp.ones((L, L), bool))
    s = jnp.where(mask, s, -1e30)
    pw = jax.nn.softmax(s, axis=-1)
    o = jnp.einsum('nhqk,nkhd->nqhd', pw, v).reshape(N, L, D)
    x = x + (o @ wo + bo)
    h2 = _layernorm(x, ln2w, ln2b)
    f = h2 @ wfc + bfc
    f = f * jax.nn.sigmoid(1.702 * f)
    return x + (f @ wpr + bpr)


def reference_forward(prompts, tokenized_prompts, pos_emb, layer_params,
                      lnf_w, lnf_b, text_projection):
    x = prompts + pos_emb
    for p in layer_params:
        x = _ref_block(x, p, N_HEADS)
    x = _layernorm(x, lnf_w, lnf_b)
    eot = jnp.argmax(tokenized_prompts, axis=-1)
    x = x[jnp.arange(x.shape[0]), eot]
    return x @ text_projection


# ----------------------------------------------------------------------------- main
if __name__ == "__main__":
    N, L, D, E = 2, 8, 32, 32  # batch, seq, transformer width, embed dim
    # TODO(synk): at these toy widths (D=E=32) every lane vector is 1/4 full; real CLIP
    # sizes (D=512, E=512) are already 128-lane aligned and use the kernel as intended.

    key = jax.random.PRNGKey(0)
    keys = iter(jax.random.split(key, 64))

    def nrm(shape, scale=0.02):
        return (scale * jax.random.normal(next(keys), shape)).astype(DTYPE)

    prompts = nrm((N, L, D), 1.0)                        # learned-context prompt embeddings
    pos_emb = nrm((L, D), 0.01)                          # positional_embedding
    tokenized_prompts = jax.random.randint(next(keys), (N, L), 0, 1000, dtype=jnp.int32)

    layer_params = []
    for _ in range(N_LAYERS):
        layer_params.append((
            (jnp.ones((D,)) + nrm((D,), 0.1)).astype(DTYPE), nrm((D,), 0.1),  # ln_1
            nrm((D, 3 * D)), nrm((3 * D,), 0.01),                             # attn in_proj
            nrm((D, D)), nrm((D,), 0.01),                                     # attn out_proj
            (jnp.ones((D,)) + nrm((D,), 0.1)).astype(DTYPE), nrm((D,), 0.1),  # ln_2
            nrm((D, 4 * D)), nrm((4 * D,), 0.01),                             # mlp c_fc
            nrm((4 * D, D)), nrm((D,), 0.01),                                 # mlp c_proj
        ))
    lnf_w = (jnp.ones((D,)) + nrm((D,), 0.1)).astype(DTYPE)                   # ln_final
    lnf_b = nrm((D,), 0.1)
    text_projection = nrm((D, E))

    out = text_encoder_forward(prompts, tokenized_prompts, pos_emb,
                               layer_params, lnf_w, lnf_b, text_projection)
    out = jax.block_until_ready(out)

    ref = reference_forward(prompts, tokenized_prompts, pos_emb,
                            layer_params, lnf_w, lnf_b, text_projection)

    assert out.shape == (N, E), out.shape
    assert bool(jnp.all(jnp.isfinite(out)))
    assert bool(jnp.allclose(out, ref, atol=1e-2, rtol=1e-2))
    print("KERNEL_OK")
</pallas_src>

<mosaic_0001>
module attributes {stable_mosaic.version = 11 : i64} {
  func.func @text_encoder_kernel(%arg0: i32, %arg1: i32, %arg2: memref<2x8x32xf32, #tpu.memory_space<vmem>>, %arg3: memref<8x32xf32, #tpu.memory_space<vmem>>, %arg4: memref<2x1xi32, #tpu.memory_space<vmem>>, %arg5: memref<8x8xf32, #tpu.memory_space<vmem>>, %arg6: memref<1x1x32xf32, #tpu.memory_space<vmem>>, %arg7: memref<1x1x32xf32, #tpu.memory_space<vmem>>, %arg8: memref<1x32x96xbf16, #tpu.memory_space<vmem>>, %arg9: memref<1x1x96xf32, #tpu.memory_space<vmem>>, %arg10: memref<1x32x32xbf16, #tpu.memory_space<vmem>>, %arg11: memref<1x1x32xf32, #tpu.memory_space<vmem>>, %arg12: memref<1x1x32xf32, #tpu.memory_space<vmem>>, %arg13: memref<1x1x32xf32, #tpu.memory_space<vmem>>, %arg14: memref<1x32x128xbf16, #tpu.memory_space<vmem>>, %arg15: memref<1x1x128xf32, #tpu.memory_space<vmem>>, %arg16: memref<1x128x32xbf16, #tpu.memory_space<vmem>>, %arg17: memref<1x1x32xf32, #tpu.memory_space<vmem>>, %arg18: memref<1x32xf32, #tpu.memory_space<vmem>>, %arg19: memref<1x32xf32, #tpu.memory_space<vmem>>, %arg20: memref<32x32xbf16, #tpu.memory_space<vmem>>, %arg21: memref<2x32xf32, #tpu.memory_space<vmem>>, %arg22: memref<16x32xf32, #tpu.memory_space<vmem>>, %arg23: memref<16x32xf32, #tpu.memory_space<vmem>>) attributes {dimension_semantics = [#tpu.dimension_semantics<parallel>, #tpu.dimension_semantics<arbitrary>], iteration_bounds = array<i64: 1, 2>, scalar_prefetch = 0 : i64, scratch_operands = 2 : i64, tpu.core_type = #tpu.core_type<tc>, window_params = [{transform_indices = @transform_0, window_bounds = array<i64: 2, 8, 32>}, {pipeline_mode = #tpu.pipeline_mode<synchronous>, transform_indices = @transform_1, window_bounds = array<i64: 8, 32>}, {transform_indices = @transform_2, window_bounds = array<i64: 2, 1>}, {pipeline_mode = #tpu.pipeline_mode<synchronous>, transform_indices = @transform_3, window_bounds = array<i64: 8, 8>}, {transform_indices = @transform_4, window_bounds = array<i64: 1, 1, 32>}, {transform_indices = @transform_5, window_bounds = array<i64: 1, 1, 32>}, {transform_indices = @transform_6, window_bounds = array<i64: 1, 32, 96>}, {transform_indices = @transform_7, window_bounds = array<i64: 1, 1, 96>}, {transform_indices = @transform_8, window_bounds = array<i64: 1, 32, 32>}, {transform_indices = @transform_9, window_bounds = array<i64: 1, 1, 32>}, {transform_indices = @transform_10, window_bounds = array<i64: 1, 1, 32>}, {transform_indices = @transform_11, window_bounds = array<i64: 1, 1, 32>}, {transform_indices = @transform_12, window_bounds = array<i64: 1, 32, 128>}, {transform_indices = @transform_13, window_bounds = array<i64: 1, 1, 128>}, {transform_indices = @transform_14, window_bounds = array<i64: 1, 128, 32>}, {transform_indices = @transform_15, window_bounds = array<i64: 1, 1, 32>}, {pipeline_mode = #tpu.pipeline_mode<synchronous>, transform_indices = @transform_16, window_bounds = array<i64: 1, 32>}, {pipeline_mode = #tpu.pipeline_mode<synchronous>, transform_indices = @transform_17, window_bounds = array<i64: 1, 32>}, {pipeline_mode = #tpu.pipeline_mode<synchronous>, transform_indices = @transform_18, window_bounds = array<i64: 32, 32>}, {transform_indices = @transform_19, window_bounds = array<i64: 2, 32>}]} {
    %c0_i32 = arith.constant 0 : i32
    %0 = arith.cmpi eq, %arg1, %c0_i32 : i32
    %1 = arith.extui %0 : i1 to i32
    %c0_i32_0 = arith.constant 0 : i32
    %2 = arith.cmpi ne, %1, %c0_i32_0 : i32
    scf.if %2 {
      %c0_85 = arith.constant 0 : index
      %c0_86 = arith.constant 0 : index
      %c0_87 = arith.constant 0 : index
      %203 = vector.load %arg2[%c0_85, %c0_86, %c0_87] : memref<2x8x32xf32, #tpu.memory_space<vmem>>, vector<2x8x32xf32>
      %c0_88 = arith.constant 0 : index
      %c0_89 = arith.constant 0 : index
      %204 = vector.load %arg3[%c0_88, %c0_89] : memref<8x32xf32, #tpu.memory_space<vmem>>, vector<8x32xf32>
      %205 = vector.shape_cast %204 : vector<8x32xf32> to vector<1x8x32xf32>
      %206 = vector.broadcast %205 : vector<1x8x32xf32> to vector<2x8x32xf32>
      %207 = arith.addf %203, %206 : vector<2x8x32xf32>
      %208 = vector.shape_cast %207 : vector<2x8x32xf32> to vector<16x32xf32>
      %c0_90 = arith.constant 0 : index
      %c0_91 = arith.constant 0 : index
      %209 = vector.load %arg22[%c0_90, %c0_91] : memref<16x32xf32, #tpu.memory_space<vmem>>, vector<16x32xf32>
      tpu.vector_store %arg22[%c0_90, %c0_91], %208 {strides = array<i32>} : memref<16x32xf32, #tpu.memory_space<vmem>>, vector<16x32xf32>,
    } else {
    }
    %c0 = arith.constant 0 : index
    %c0_1 = arith.constant 0 : index
    %3 = vector.load %arg22[%c0, %c0_1] : memref<16x32xf32, #tpu.memory_space<vmem>>, vector<16x32xf32>
    %c0_2 = arith.constant 0 : index
    %c0_3 = arith.constant 0 : index
    %c0_4 = arith.constant 0 : index
    %4 = vector.load %arg6[%c0_2, %c0_3, %c0_4] : memref<1x1x32xf32, #tpu.memory_space<vmem>>, vector<1x1x32xf32>
    %5 = vector.shape_cast %4 : vector<1x1x32xf32> to vector<1x32xf32>
    %c0_5 = arith.constant 0 : index
    %c0_6 = arith.constant 0 : index
    %c0_7 = arith.constant 0 : index
    %6 = vector.load %arg7[%c0_5, %c0_6, %c0_7] : memref<1x1x32xf32, #tpu.memory_space<vmem>>, vector<1x1x32xf32>
    %7 = vector.shape_cast %6 : vector<1x1x32xf32> to vector<1x32xf32>
    %cst = arith.constant dense<0.000000e+00> : vector<16xf32>
    %8 = vector.multi_reduction <add>, %3, %cst [1] : vector<16x32xf32> to vector<16xf32>
    %9 = vector.shape_cast %8 : vector<16xf32> to vector<16x1xf32>
    %cst_8 = arith.constant 3.200000e+01 : f32
    %10 = vector.broadcast %cst_8 : f32 to vector<16x1xf32>
    %11 = arith.divf %9, %10 : vector<16x1xf32>
    %12 = vector.broadcast %11 : vector<16x1xf32> to vector<16x32xf32>
    %13 = arith.subf %3, %12 : vector<16x32xf32>
    %14 = arith.mulf %13, %13 : vector<16x32xf32>
    %cst_9 = arith.constant dense<0.000000e+00> : vector<16xf32>
    %15 = vector.multi_reduction <add>, %14, %cst_9 [1] : vector<16x32xf32> to vector<16xf32>
    %16 = vector.shape_cast %15 : vector<16xf32> to vector<16x1xf32>
    %cst_10 = arith.constant 3.200000e+01 : f32
    %17 = vector.broadcast %cst_10 : f32 to vector<16x1xf32>
    %18 = arith.divf %16, %17 : vector<16x1xf32>
    %19 = vector.broadcast %11 : vector<16x1xf32> to vector<16x32xf32>
    %20 = arith.subf %3, %19 : vector<16x32xf32>
    %cst_11 = arith.constant 9.99999974E-6 : f32
    %21 = vector.broadcast %cst_11 : f32 to vector<16x1xf32>
    %22 = arith.addf %18, %21 : vector<16x1xf32>
    %23 = math.rsqrt %22 : vector<16x1xf32>
    %24 = vector.broadcast %23 : vector<16x1xf32> to vector<16x32xf32>
    %25 = arith.mulf %20, %24 : vector<16x32xf32>
    %26 = vector.broadcast %5 : vector<1x32xf32> to vector<16x32xf32>
    %27 = arith.mulf %25, %26 : vector<16x32xf32>
    %28 = vector.broadcast %7 : vector<1x32xf32> to vector<16x32xf32>
    %29 = arith.addf %27, %28 : vector<16x32xf32>
    %30 = arith.truncf %29 : vector<16x32xf32> to vector<16x32xbf16>
    %c0_12 = arith.constant 0 : index
    %c0_13 = arith.constant 0 : index
    %c0_14 = arith.constant 0 : index
    %31 = vector.load %arg8[%c0_12, %c0_13, %c0_14] : memref<1x32x96xbf16, #tpu.memory_space<vmem>>, vector<1x32x96xbf16>
    %32 = vector.shape_cast %31 : vector<1x32x96xbf16> to vector<32x96xbf16>
    %cst_15 = arith.constant dense<0.000000e+00> : vector<16x96xf32>
    %33 = tpu.matmul %30, %32, %cst_15 {dimension_numbers = #tpu.dot_dimension_numbers<[1], [0], [0], [1], [0, 0, 1, 1], [], []>} : vector<16x32xbf16>, vector<32x96xbf16>, vector<16x96xf32> -> vector<16x96xf32>
    %c0_16 = arith.constant 0 : index
    %c0_17 = arith.constant 0 : index
    %c0_18 = arith.constant 0 : index
    %34 = vector.load %arg9[%c0_16, %c0_17, %c0_18] : memref<1x1x96xf32, #tpu.memory_space<vmem>>, vector<1x1x96xf32>
    %35 = vector.shape_cast %34 : vector<1x1x96xf32> to vector<1x96xf32>
    %36 = vector.broadcast %35 : vector<1x96xf32> to vector<16x96xf32>
    %37 = arith.addf %33, %36 : vector<16x96xf32>
    %38 = vector.shape_cast %37 : vector<16x96xf32> to vector<2x8x96xf32>
    %c0_19 = arith.constant 0 : index
    %c0_20 = arith.constant 0 : index
    %39 = vector.load %arg5[%c0_19, %c0_20] : memref<8x8xf32, #tpu.memory_space<vmem>>, vector<8x8xf32>
    %40 = vector.shape_cast %39 : vector<8x8xf32> to vector<1x8x8xf32>
    %41 = vector.broadcast %40 : vector<1x8x8xf32> to vector<2x8x8xf32>
    %42 = vector.extract_strided_slice %38 {offsets = [0, 0, 0], sizes = [2, 8, 8], strides = [1, 1, 1]} : vector<2x8x96xf32> to vector<2x8x8xf32>
    %cst_21 = arith.constant 0.353553385 : f32
    %43 = vector.broadcast %cst_21 : f32 to vector<2x8x8xf32>
    %44 = arith.mulf %42, %43 : vector<2x8x8xf32>
    %45 = vector.extract_strided_slice %38 {offsets = [0, 0, 32], sizes = [2, 8, 8], strides = [1, 1, 1]} : vector<2x8x96xf32> to vector<2x8x8xf32>
    %46 = vector.extract_strided_slice %38 {offsets = [0, 0, 64], sizes = [2, 8, 8], strides = [1, 1, 1]} : vector<2x8x96xf32> to vector<2x8x8xf32>
    %47 = arith.truncf %44 : vector<2x8x8xf32> to vector<2x8x8xbf16>
    %48 = arith.truncf %45 : vector<2x8x8xf32> to vector<2x8x8xbf16>
    "tpu.trace_start"() <{level = 10 : i32, message = "nqd,nkd->nqk"}> : () -> ()
    %cst_22 = arith.constant dense<0.000000e+00> : vector<2x8x8xf32>
    %49 = tpu.matmul %47, %48, %cst_22 {dimension_numbers = #tpu.dot_dimension_numbers<[2], [2], [1], [1], [0, 0, 0, 1, 1, 1], [0], [0]>} : vector<2x8x8xbf16>, vector<2x8x8xbf16>, vector<2x8x8xf32> -> vector<2x8x8xf32>
    "tpu.trace_stop"() : () -> ()
    %50 = arith.addf %49, %41 : vector<2x8x8xf32>
    %cst_23 = arith.constant dense<0xFF800000> : vector<2x8xf32>
    %51 = vector.multi_reduction <maximumf>, %50, %cst_23 [2] : vector<2x8x8xf32> to vector<2x8xf32>
    %52 = vector.shape_cast %51 : vector<2x8xf32> to vector<2x8x1xf32>
    %53 = vector.broadcast %52 : vector<2x8x1xf32> to vector<2x8x8xf32>
    %54 = arith.subf %50, %53 : vector<2x8x8xf32>
    %55 = math.exp %54 : vector<2x8x8xf32>
    %cst_24 = arith.constant dense<0.000000e+00> : vector<2x8xf32>
    %56 = vector.multi_reduction <add>, %55, %cst_24 [2] : vector<2x8x8xf32> to vector<2x8xf32>
    %57 = vector.shape_cast %56 : vector<2x8xf32> to vector<2x8x1xf32>
    %58 = tpu.reciprocal %57 {approx = true} : vector<2x8x1xf32> -> vector<2x8x1xf32>
    %59 = vector.broadcast %58 : vector<2x8x1xf32> to vector<2x8x8xf32>
    %60 = arith.mulf %55, %59 : vector<2x8x8xf32>
    %61 = arith.truncf %60 : vector<2x8x8xf32> to vector<2x8x8xbf16>
    %62 = arith.truncf %46 : vector<2x8x8xf32> to vector<2x8x8xbf16>
    "tpu.trace_start"() <{level = 10 : i32, message = "nqk,nkd->nqd"}> : () -> ()
    %cst_25 = arith.constant dense<0.000000e+00> : vector<2x8x8xf32>
    %63 = tpu.matmul %61, %62, %cst_25 {dimension_numbers = #tpu.dot_dimension_numbers<[2], [1], [1], [2], [0, 0, 0, 1, 1, 2], [0], [0]>} : vector<2x8x8xbf16>, vector<2x8x8xbf16>, vector<2x8x8xf32> -> vector<2x8x8xf32>
    "tpu.trace_stop"() : () -> ()
    %64 = vector.shape_cast %63 : vector<2x8x8xf32> to vector<16x8xf32>
    %c0_26 = arith.constant 0 : index
    %c0_27 = arith.constant 0 : index
    %65 = vector.load %arg23[%c0_26, %c0_27] : memref<16x32xf32, #tpu.memory_space<vmem>>, vector<16x8xf32>
    tpu.vector_store %arg23[%c0_26, %c0_27], %64 {strides = array<i32>} : memref<16x32xf32, #tpu.memory_space<vmem>>, vector<16x8xf32>,
    %66 = vector.extract_strided_slice %38 {offsets = [0, 0, 8], sizes = [2, 8, 8], strides = [1, 1, 1]} : vector<2x8x96xf32> to vector<2x8x8xf32>
    %cst_28 = arith.constant 0.353553385 : f32
    %67 = vector.broadcast %cst_28 : f32 to vector<2x8x8xf32>
    %68 = arith.mulf %66, %67 : vector<2x8x8xf32>
    %69 = vector.extract_strided_slice %38 {offsets = [0, 0, 40], sizes = [2, 8, 8], strides = [1, 1, 1]} : vector<2x8x96xf32> to vector<2x8x8xf32>
    %70 = vector.extract_strided_slice %38 {offsets = [0, 0, 72], sizes = [2, 8, 8], strides = [1, 1, 1]} : vector<2x8x96xf32> to vector<2x8x8xf32>
    %71 = arith.truncf %68 : vector<2x8x8xf32> to vector<2x8x8xbf16>
    %72 = arith.truncf %69 : vector<2x8x8xf32> to vector<2x8x8xbf16>
    "tpu.trace_start"() <{level = 10 : i32, message = "nqd,nkd->nqk"}> : () -> ()
    %cst_29 = arith.constant dense<0.000000e+00> : vector<2x8x8xf32>
    %73 = tpu.matmul %71, %72, %cst_29 {dimension_numbers = #tpu.dot_dimension_numbers<[2], [2], [1], [1], [0, 0, 0, 1, 1, 1], [0], [0]>} : vector<2x8x8xbf16>, vector<2x8x8xbf16>, vector<2x8x8xf32> -> vector<2x8x8xf32>
    "tpu.trace_stop"() : () -> ()
    %74 = arith.addf %73, %41 : vector<2x8x8xf32>
    %cst_30 = arith.constant dense<0xFF800000> : vector<2x8xf32>
    %75 = vector.multi_reduction <maximumf>, %74, %cst_30 [2] : vector<2x8x8xf32> to vector<2x8xf32>
    %76 = vector.shape_cast %75 : vector<2x8xf32> to vector<2x8x1xf32>
    %77 = vector.broadcast %76 : vector<2x8x1xf32> to vector<2x8x8xf32>
    %78 = arith.subf %74, %77 : vector<2x8x8xf32>
    %79 = math.exp %78 : vector<2x8x8xf32>
    %cst_31 = arith.constant dense<0.000000e+00> : vector<2x8xf32>
    %80 = vector.multi_reduction <add>, %79, %cst_31 [2] : vector<2x8x8xf32> to vector<2x8xf32>
    %81 = vector.shape_cast %80 : vector<2x8xf32> to vector<2x8x1xf32>
    %82 = tpu.reciprocal %81 {approx = true} : vector<2x8x1xf32> -> vector<2x8x1xf32>
    %83 = vector.broadcast %82 : vector<2x8x1xf32> to vector<2x8x8xf32>
    %84 = arith.mulf %79, %83 : vector<2x8x8xf32>
    %85 = arith.truncf %84 : vector<2x8x8xf32> to vector<2x8x8xbf16>
    %86 = arith.truncf %70 : vector<2x8x8xf32> to vector<2x8x8xbf16>
    "tpu.trace_start"() <{level = 10 : i32, message = "nqk,nkd->nqd"}> : () -> ()
    %cst_32 = arith.constant dense<0.000000e+00> : vector<2x8x8xf32>
    %87 = tpu.matmul %85, %86, %cst_32 {dimension_numbers = #tpu.dot_dimension_numbers<[2], [1], [1], [2], [0, 0, 0, 1, 1, 2], [0], [0]>} : vector<2x8x8xbf16>, vector<2x8x8xbf16>, vector<2x8x8xf32> -> vector<2x8x8xf32>
    "tpu.trace_stop"() : () -> ()
    %88 = vector.shape_cast %87 : vector<2x8x8xf32> to vector<16x8xf32>
    %c0_33 = arith.constant 0 : index
    %c8 = arith.constant 8 : index
    %89 = vector.load %arg23[%c0_33, %c8] : memref<16x32xf32, #tpu.memory_space<vmem>>, vector<16x8xf32>
    tpu.vector_store %arg23[%c0_33, %c8], %88 {strides = array<i32>} : memref<16x32xf32, #tpu.memory_space<vmem>>, vector<16x8xf32>,
    %90 = vector.extract_strided_slice %38 {offsets = [0, 0, 16], sizes = [2, 8, 8], strides = [1, 1, 1]} : vector<2x8x96xf32> to vector<2x8x8xf32>
    %cst_34 = arith.constant 0.353553385 : f32
    %91 = vector.broadcast %cst_34 : f32 to vector<2x8x8xf32>
    %92 = arith.mulf %90, %91 : vector<2x8x8xf32>
    %93 = vector.extract_strided_slice %38 {offsets = [0, 0, 48], sizes = [2, 8, 8], strides = [1, 1, 1]} : vector<2x8x96xf32> to vector<2x8x8xf32>
    %94 = vector.extract_strided_slice %38 {offsets = [0, 0, 80], sizes = [2, 8, 8], strides = [1, 1, 1]} : vector<2x8x96xf32> to vector<2x8x8xf32>
    %95 = arith.truncf %92 : vector<2x8x8xf32> to vector<2x8x8xbf16>
    %96 = arith.truncf %93 : vector<2x8x8xf32> to vector<2x8x8xbf16>
    "tpu.trace_start"() <{level = 10 : i32, message = "nqd,nkd->nqk"}> : () -> ()
    %cst_35 = arith.constant dense<0.000000e+00> : vector<2x8x8xf32>
    %97 = tpu.matmul %95, %96, %cst_35 {dimension_numbers = #tpu.dot_dimension_numbers<[2], [2], [1], [1], [0, 0, 0, 1, 1, 1], [0], [0]>} : vector<2x8x8xbf16>, vector<2x8x8xbf16>, vector<2x8x8xf32> -> vector<2x8x8xf32>
    "tpu.trace_stop"() : () -> ()
    %98 = arith.addf %97, %41 : vector<2x8x8xf32>
    %cst_36 = arith.constant dense<0xFF800000> : vector<2x8xf32>
    %99 = vector.multi_reduction <maximumf>, %98, %cst_36 [2] : vector<2x8x8xf32> to vector<2x8xf32>
    %100 = vector.shape_cast %99 : vector<2x8xf32> to vector<2x8x1xf32>
    %101 = vector.broadcast %100 : vector<2x8x1xf32> to vector<2x8x8xf32>
    %102 = arith.subf %98, %101 : vector<2x8x8xf32>
    %103 = math.exp %102 : vector<2x8x8xf32>
    %cst_37 = arith.constant dense<0.000000e+00> : vector<2x8xf32>
    %104 = vector.multi_reduction <add>, %103, %cst_37 [2] : vector<2x8x8xf32> to vector<2x8xf32>
    %105 = vector.shape_cast %104 : vector<2x8xf32> to vector<2x8x1xf32>
    %106 = tpu.reciprocal %105 {approx = true} : vector<2x8x1xf32> -> vector<2x8x1xf32>
    %107 = vector.broadcast %106 : vector<2x8x1xf32> to vector<2x8x8xf32>
    %108 = arith.mulf %103, %107 : vector<2x8x8xf32>
    %109 = arith.truncf %108 : vector<2x8x8xf32> to vector<2x8x8xbf16>
    %110 = arith.truncf %94 : vector<2x8x8xf32> to vector<2x8x8xbf16>
    "tpu.trace_start"() <{level = 10 : i32, message = "nqk,nkd->nqd"}> : () -> ()
    %cst_38 = arith.constant dense<0.000000e+00> : vector<2x8x8xf32>
    %111 = tpu.matmul %109, %110, %cst_38 {dimension_numbers = #tpu.dot_dimension_numbers<[2], [1], [1], [2], [0, 0, 0, 1, 1, 2], [0], [0]>} : vector<2x8x8xbf16>, vector<2x8x8xbf16>, vector<2x8x8xf32> -> vector<2x8x8xf32>
    "tpu.trace_stop"() : () -> ()
    %112 = vector.shape_cast %111 : vector<2x8x8xf32> to vector<16x8xf32>
    %c0_39 = arith.constant 0 : index
    %c16 = arith.constant 16 : index
    %113 = vector.load %arg23[%c0_39, %c16] : memref<16x32xf32, #tpu.memory_space<vmem>>, vector<16x8xf32>
    tpu.vector_store %arg23[%c0_39, %c16], %112 {strides = array<i32>} : memref<16x32xf32, #tpu.memory_space<vmem>>, vector<16x8xf32>,
    %114 = vector.extract_strided_slice %38 {offsets = [0, 0, 24], sizes = [2, 8, 8], strides = [1, 1, 1]} : vector<2x8x96xf32> to vector<2x8x8xf32>
    %cst_40 = arith.constant 0.353553385 : f32
    %115 = vector.broadcast %cst_40 : f32 to vector<2x8x8xf32>
    %116 = arith.mulf %114, %115 : vector<2x8x8xf32>
    %117 = vector.extract_strided_slice %38 {offsets = [0, 0, 56], sizes = [2, 8, 8], strides = [1, 1, 1]} : vector<2x8x96xf32> to vector<2x8x8xf32>
    %118 = vector.extract_strided_slice %38 {offsets = [0, 0, 88], sizes = [2, 8, 8], strides = [1, 1, 1]} : vector<2x8x96xf32> to vector<2x8x8xf32>
    %119 = arith.truncf %116 : vector<2x8x8xf32> to vector<2x8x8xbf16>
    %120 = arith.truncf %117 : vector<2x8x8xf32> to vector<2x8x8xbf16>
    "tpu.trace_start"() <{level = 10 : i32, message = "nqd,nkd->nqk"}> : () -> ()
    %cst_41 = arith.constant dense<0.000000e+00> : vector<2x8x8xf32>
    %121 = tpu.matmul %119, %120, %cst_41 {dimension_numbers = #tpu.dot_dimension_numbers<[2], [2], [1], [1], [0, 0, 0, 1, 1, 1], [0], [0]>} : vector<2x8x8xbf16>, vector<2x8x8xbf16>, vector<2x8x8xf32> -> vector<2x8x8xf32>
    "tpu.trace_stop"() : () -> ()
    %122 = arith.addf %121, %41 : vector<2x8x8xf32>
    %cst_42 = arith.constant dense<0xFF800000> : vector<2x8xf32>
    %123 = vector.multi_reduction <maximumf>, %122, %cst_42 [2] : vector<2x8x8xf32> to vector<2x8xf32>
    %124 = vector.shape_cast %123 : vector<2x8xf32> to vector<2x8x1xf32>
    %125 = vector.broadcast %124 : vector<2x8x1xf32> to vector<2x8x8xf32>
    %126 = arith.subf %122, %125 : vector<2x8x8xf32>
    %127 = math.exp %126 : vector<2x8x8xf32>
    %cst_43 = arith.constant dense<0.000000e+00> : vector<2x8xf32>
    %128 = vector.multi_reduction <add>, %127, %cst_43 [2] : vector<2x8x8xf32> to vector<2x8xf32>
    %129 = vector.shape_cast %128 : vector<2x8xf32> to vector<2x8x1xf32>
    %130 = tpu.reciprocal %129 {approx = true} : vector<2x8x1xf32> -> vector<2x8x1xf32>
    %131 = vector.broadcast %130 : vector<2x8x1xf32> to vector<2x8x8xf32>
    %132 = arith.mulf %127, %131 : vector<2x8x8xf32>
    %133 = arith.truncf %132 : vector<2x8x8xf32> to vector<2x8x8xbf16>
    %134 = arith.truncf %118 : vector<2x8x8xf32> to vector<2x8x8xbf16>
    "tpu.trace_start"() <{level = 10 : i32, message = "nqk,nkd->nqd"}> : () -> ()
    %cst_44 = arith.constant dense<0.000000e+00> : vector<2x8x8xf32>
    %135 = tpu.matmul %133, %134, %cst_44 {dimension_numbers = #tpu.dot_dimension_numbers<[2], [1], [1], [2], [0, 0, 0, 1, 1, 2], [0], [0]>} : vector<2x8x8xbf16>, vector<2x8x8xbf16>, vector<2x8x8xf32> -> vector<2x8x8xf32>
    "tpu.trace_stop"() : () -> ()
    %136 = vector.shape_cast %135 : vector<2x8x8xf32> to vector<16x8xf32>
    %c0_45 = arith.constant 0 : index
    %c24 = arith.constant 24 : index
    %137 = vector.load %arg23[%c0_45, %c24] : memref<16x32xf32, #tpu.memory_space<vmem>>, vector<16x8xf32>
    tpu.vector_store %arg23[%c0_45, %c24], %136 {strides = array<i32>} : memref<16x32xf32, #tpu.memory_space<vmem>>, vector<16x8xf32>,
    %c0_46 = arith.constant 0 : index
    %c0_47 = arith.constant 0 : index
    %138 = vector.load %arg23[%c0_46, %c0_47] : memref<16x32xf32, #tpu.memory_space<vmem>>, vector<16x32xf32>
    %139 = arith.truncf %138 : vector<16x32xf32> to vector<16x32xbf16>
    %c0_48 = arith.constant 0 : index
    %c0_49 = arith.constant 0 : index
    %c0_50 = arith.constant 0 : index
    %140 = vector.load %arg10[%c0_48, %c0_49, %c0_50] : memref<1x32x32xbf16, #tpu.memory_space<vmem>>, vector<1x32x32xbf16>
    %141 = vector.shape_cast %140 : vector<1x32x32xbf16> to vector<32x32xbf16>
    %cst_51 = arith.constant dense<0.000000e+00> : vector<16x32xf32>
    %142 = tpu.matmul %139, %141, %cst_51 {dimension_numbers = #tpu.dot_dimension_numbers<[1], [0], [0], [1], [0, 0, 1, 1], [], []>} : vector<16x32xbf16>, vector<32x32xbf16>, vector<16x32xf32> -> vector<16x32xf32>
    %c0_52 = arith.constant 0 : index
    %c0_53 = arith.constant 0 : index
    %c0_54 = arith.constant 0 : index
    %143 = vector.load %arg11[%c0_52, %c0_53, %c0_54] : memref<1x1x32xf32, #tpu.memory_space<vmem>>, vector<1x1x32xf32>
    %144 = vector.shape_cast %143 : vector<1x1x32xf32> to vector<1x32xf32>
    %145 = vector.broadcast %144 : vector<1x32xf32> to vector<16x32xf32>
    %146 = arith.addf %142, %145 : vector<16x32xf32>
    %147 = arith.addf %3, %146 : vector<16x32xf32>
    %c0_55 = arith.constant 0 : index
    %c0_56 = arith.constant 0 : index
    %c0_57 = arith.constant 0 : index
    %148 = vector.load %arg12[%c0_55, %c0_56, %c0_57] : memref<1x1x32xf32, #tpu.memory_space<vmem>>, vector<1x1x32xf32>
    %149 = vector.shape_cast %148 : vector<1x1x32xf32> to vector<1x32xf32>
    %c0_58 = arith.constant 0 : index
    %c0_59 = arith.constant 0 : index
    %c0_60 = arith.constant 0 : index
    %150 = vector.load %arg13[%c0_58, %c0_59, %c0_60] : memref<1x1x32xf32, #tpu.memory_space<vmem>>, vector<1x1x32xf32>
    %151 = vector.shape_cast %150 : vector<1x1x32xf32> to vector<1x32xf32>
    %cst_61 = arith.constant dense<0.000000e+00> : vector<16xf32>
    %152 = vector.multi_reduction <add>, %147, %cst_61 [1] : vector<16x32xf32> to vector<16xf32>
    %153 = vector.shape_cast %152 : vector<16xf32> to vector<16x1xf32>
    %cst_62 = arith.constant 3.200000e+01 : f32
    %154 = vector.broadcast %cst_62 : f32 to vector<16x1xf32>
    %155 = arith.divf %153, %154 : vector<16x1xf32>
    %156 = vector.broadcast %155 : vector<16x1xf32> to vector<16x32xf32>
    %157 = arith.subf %147, %156 : vector<16x32xf32>
    %158 = arith.mulf %157, %157 : vector<16x32xf32>
    %cst_63 = arith.constant dense<0.000000e+00> : vector<16xf32>
    %159 = vector.multi_reduction <add>, %158, %cst_63 [1] : vector<16x32xf32> to vector<16xf32>
    %160 = vector.shape_cast %159 : vector<16xf32> to vector<16x1xf32>
    %cst_64 = arith.constant 3.200000e+01 : f32
    %161 = vector.broadcast %cst_64 : f32 to vector<16x1xf32>
    %162 = arith.divf %160, %161 : vector<16x1xf32>
    %163 = vector.broadcast %155 : vector<16x1xf32> to vector<16x32xf32>
    %164 = arith.subf %147, %163 : vector<16x32xf32>
    %cst_65 = arith.constant 9.99999974E-6 : f32
    %165 = vector.broadcast %cst_65 : f32 to vector<16x1xf32>
    %166 = arith.addf %162, %165 : vector<16x1xf32>
    %167 = math.rsqrt %166 : vector<16x1xf32>
    %168 = vector.broadcast %167 : vector<16x1xf32> to vector<16x32xf32>
    %169 = arith.mulf %164, %168 : vector<16x32xf32>
    %170 = vector.broadcast %149 : vector<1x32xf32> to vector<16x32xf32>
    %171 = arith.mulf %169, %170 : vector<16x32xf32>
    %172 = vector.broadcast %151 : vector<1x32xf32> to vector<16x32xf32>
    %173 = arith.addf %171, %172 : vector<16x32xf32>
    %174 = arith.truncf %173 : vector<16x32xf32> to vector<16x32xbf16>
    %c0_66 = arith.constant 0 : index
    %c0_67 = arith.constant 0 : index
    %c0_68 = arith.constant 0 : index
    %175 = vector.load %arg14[%c0_66, %c0_67, %c0_68] : memref<1x32x128xbf16, #tpu.memory_space<vmem>>, vector<1x32x128xbf16>
    %176 = vector.shape_cast %175 : vector<1x32x128xbf16> to vector<32x128xbf16>
    %cst_69 = arith.constant dense<0.000000e+00> : vector<16x128xf32>
    %177 = tpu.matmul %174, %176, %cst_69 {dimension_numbers = #tpu.dot_dimension_numbers<[1], [0], [0], [1], [0, 0, 1, 1], [], []>} : vector<16x32xbf16>, vector<32x128xbf16>, vector<16x128xf32> -> vector<16x128xf32>
    %c0_70 = arith.constant 0 : index
    %c0_71 = arith.constant 0 : index
    %c0_72 = arith.constant 0 : index
    %178 = vector.load %arg15[%c0_70, %c0_71, %c0_72] : memref<1x1x128xf32, #tpu.memory_space<vmem>>, vector<1x1x128xf32>
    %179 = vector.shape_cast %178 : vector<1x1x128xf32> to vector<1x128xf32>
    %180 = vector.broadcast %179 : vector<1x128xf32> to vector<16x128xf32>
    %181 = arith.addf %177, %180 : vector<16x128xf32>
    %cst_73 = arith.constant 1.702000e+00 : f32
    %182 = vector.broadcast %cst_73 : f32 to vector<16x128xf32>
    %183 = arith.mulf %182, %181 : vector<16x128xf32>
    %184 = arith.negf %183 : vector<16x128xf32>
    %185 = math.exp %184 : vector<16x128xf32>
    %cst_74 = arith.constant 1.000000e+00 : f32
    %186 = vector.broadcast %cst_74 : f32 to vector<16x128xf32>
    %187 = arith.addf %186, %185 : vector<16x128xf32>
    %188 = arith.divf %186, %187 : vector<16x128xf32>
    %189 = arith.mulf %181, %188 : vector<16x128xf32>
    %190 = arith.truncf %189 : vector<16x128xf32> to vector<16x128xbf16>
    %c0_75 = arith.constant 0 : index
    %c0_76 = arith.constant 0 : index
    %c0_77 = arith.constant 0 : index
    %191 = vector.load %arg16[%c0_75, %c0_76, %c0_77] : memref<1x128x32xbf16, #tpu.memory_space<vmem>>, vector<1x128x32xbf16>
    %192 = vector.shape_cast %191 : vector<1x128x32xbf16> to vector<128x32xbf16>
    %cst_78 = arith.constant dense<0.000000e+00> : vector<16x32xf32>
    %193 = tpu.matmul %190, %192, %cst_78 {dimension_numbers = #tpu.dot_dimension_numbers<[1], [0], [0], [1], [0, 0, 1, 1], [], []>} : vector<16x128xbf16>, vector<128x32xbf16>, vector<16x32xf32> -> vector<16x32xf32>
    %c0_79 = arith.constant 0 : index
    %c0_80 = arith.constant 0 : index
    %c0_81 = arith.constant 0 : index
    %194 = vector.load %arg17[%c0_79, %c0_80, %c0_81] : memref<1x1x32xf32, #tpu.memory_space<vmem>>, vector<1x1x32xf32>
    %195 = vector.shape_cast %194 : vector<1x1x32xf32> to vector<1x32xf32>
    %196 = vector.broadcast %195 : vector<1x32xf32> to vector<16x32xf32>
    %197 = arith.addf %193, %196 : vector<16x32xf32>
    %198 = arith.addf %147, %197 : vector<16x32xf32>
    %c0_82 = arith.constant 0 : index
    %c0_83 = arith.constant 0 : index
    %199 = vector.load %arg22[%c0_82, %c0_83] : memref<16x32xf32, #tpu.memory_space<vmem>>, vector<16x32xf32>
    tpu.vector_store %arg22[%c0_82, %c0_83], %198 {strides = array<i32>} : memref<16x32xf32, #tpu.memory_space<vmem>>, vector<16x32xf32>,
    %c1_i32 = arith.constant 1 : i32
    %200 = arith.cmpi eq, %arg1, %c1_i32 : i32
    %201 = arith.extui %200 : i1 to i32
    %c0_i32_84 = arith.constant 0 : i32
    %202 = arith.cmpi ne, %201, %c0_i32_84 : i32
    scf.if %202 {
      %203 = tpu.iota {dimensions = array<i32: 0>} : vector<2x1xi32>
      %c8_i32 = arith.constant 8 : i32
      %204 = vector.broadcast %c8_i32 : i32 to vector<2x1xi32>
      %205 = arith.muli %203, %204 : vector<2x1xi32>
      %c0_85 = arith.constant 0 : index
      %c0_86 = arith.constant 0 : index
      %206 = vector.load %arg4[%c0_85, %c0_86] : memref<2x1xi32, #tpu.memory_space<vmem>>, vector<2x1xi32>
      %207 = arith.addi %205, %206 : vector<2x1xi32>
      %208 = tpu.iota {dimensions = array<i32: 1>} : vector<2x16xi32>
      %209 = vector.broadcast %207 : vector<2x1xi32> to vector<2x16xi32>
      %210 = arith.cmpi eq, %208, %209 : vector<2x16xi32>
      %211 = arith.extui %210 : vector<2x16xi1> to vector<2x16xi32>
      %212 = arith.sitofp %211 : vector<2x16xi32> to vector<2x16xf32>
      %cst_87 = arith.constant dense<0.000000e+00> : vector<2x32xf32>
      %213 = tpu.matmul %212, %198, %cst_87 {dimension_numbers = #tpu.dot_dimension_numbers<[1], [0], [0], [1], [0, 0, 1, 1], [], []>} : vector<2x16xf32>, vector<16x32xf32>, vector<2x32xf32> -> vector<2x32xf32>
      %c0_88 = arith.constant 0 : index
      %c0_89 = arith.constant 0 : index
      %214 = vector.load %arg18[%c0_88, %c0_89] : memref<1x32xf32, #tpu.memory_space<vmem>>, vector<1x32xf32>
      %c0_90 = arith.constant 0 : index
      %c0_91 = arith.constant 0 : index
      %215 = vector.load %arg19[%c0_90, %c0_91] : memref<1x32xf32, #tpu.memory_space<vmem>>, vector<1x32xf32>
      %cst_92 = arith.constant dense<0.000000e+00> : vector<2xf32>
      %216 = vector.multi_reduction <add>, %213, %cst_92 [1] : vector<2x32xf32> to vector<2xf32>
      %217 = vector.shape_cast %216 : vector<2xf32> to vector<2x1xf32>
      %cst_93 = arith.constant 3.200000e+01 : f32
      %218 = vector.broadcast %cst_93 : f32 to vector<2x1xf32>
      %219 = arith.divf %217, %218 : vector<2x1xf32>
      %220 = vector.broadcast %219 : vector<2x1xf32> to vector<2x32xf32>
      %221 = arith.subf %213, %220 : vector<2x32xf32>
      %222 = arith.mulf %221, %221 : vector<2x32xf32>
      %cst_94 = arith.constant dense<0.000000e+00> : vector<2xf32>
      %223 = vector.multi_reduction <add>, %222, %cst_94 [1] : vector<2x32xf32> to vector<2xf32>
      %224 = vector.shape_cast %223 : vector<2xf32> to vector<2x1xf32>
      %cst_95 = arith.constant 3.200000e+01 : f32
      %225 = vector.broadcast %cst_95 : f32 to vector<2x1xf32>
      %226 = arith.divf %224, %225 : vector<2x1xf32>
      %227 = vector.broadcast %219 : vector<2x1xf32> to vector<2x32xf32>
      %228 = arith.subf %213, %227 : vector<2x32xf32>
      %cst_96 = arith.constant 9.99999974E-6 : f32
      %229 = vector.broadcast %cst_96 : f32 to vector<2x1xf32>
      %230 = arith.addf %226, %229 : vector<2x1xf32>
      %231 = math.rsqrt %230 : vector<2x1xf32>
      %232 = vector.broadcast %231 : vector<2x1xf32> to vector<2x32xf32>
      %233 = arith.mulf %228, %232 : vector<2x32xf32>
      %234 = vector.broadcast %214 : vector<1x32xf32> to vector<2x32xf32>
      %235 = arith.mulf %233, %234 : vector<2x32xf32>
      %236 = vector.broadcast %215 : vector<1x32xf32> to vector<2x32xf32>
      %237 = arith.addf %235, %236 : vector<2x32xf32>
      %238 = arith.truncf %237 : vector<2x32xf32> to vector<2x32xbf16>
      %c0_97 = arith.constant 0 : index
      %c0_98 = arith.constant 0 : index
      %239 = vector.load %arg20[%c0_97, %c0_98] : memref<32x32xbf16, #tpu.memory_space<vmem>>, vector<32x32xbf16>
      %cst_99 = arith.constant dense<0.000000e+00> : vector<2x32xf32>
      %240 = tpu.matmul %238, %239, %cst_99 {dimension_numbers = #tpu.dot_dimension_numbers<[1], [0], [0], [1], [0, 0, 1, 1], [], []>} : vector<2x32xbf16>, vector<32x32xbf16>, vector<2x32xf32> -> vector<2x32xf32>
      %c0_100 = arith.constant 0 : index
      %c0_101 = arith.constant 0 : index
      %241 = vector.load %arg21[%c0_100, %c0_101] : memref<2x32xf32, #tpu.memory_space<vmem>>, vector<2x32xf32>
      tpu.vector_store %arg21[%c0_100, %c0_101], %240 {strides = array<i32>} : memref<2x32xf32, #tpu.memory_space<vmem>>, vector<2x32xf32>,
    } else {
    }
    return
  }
  func.func @transform_0(%arg0: i32, %arg1: i32) -> (i32, i32, i32) {
    %c0_i32 = arith.constant 0 : i32
    %c0_i32_0 = arith.constant 0 : i32
    %c0_i32_1 = arith.constant 0 : i32
    return %arg0, %c0_i32, %c0_i32_0 : i32, i32, i32
  }
  func.func @transform_1(%arg0: i32, %arg1: i32) -> (i32, i32) {
    %c0_i32 = arith.constant 0 : i32
    %c0_i32_0 = arith.constant 0 : i32
    %c0_i32_1 = arith.constant 0 : i32
    return %c0_i32, %c0_i32_0 : i32, i32
  }
  func.func @transform_2(%arg0: i32, %arg1: i32) -> (i32, i32) {
    %c0_i32 = arith.constant 0 : i32
    %c0_i32_0 = arith.constant 0 : i32
    return %arg0, %c0_i32 : i32, i32
  }
  func.func @transform_3(%arg0: i32, %arg1: i32) -> (i32, i32) {
    %c0_i32 = arith.constant 0 : i32
    %c0_i32_0 = arith.constant 0 : i32
    %c0_i32_1 = arith.constant 0 : i32
    return %c0_i32, %c0_i32_0 : i32, i32
  }
  func.func @transform_4(%arg0: i32, %arg1: i32) -> (i32, i32, i32) {
    %c0_i32 = arith.constant 0 : i32
    %c0_i32_0 = arith.constant 0 : i32
    %c0_i32_1 = arith.constant 0 : i32
    return %arg1, %c0_i32, %c0_i32_0 : i32, i32, i32
  }
  func.func @transform_5(%arg0: i32, %arg1: i32) -> (i32, i32, i32) {
    %c0_i32 = arith.constant 0 : i32
    %c0_i32_0 = arith.constant 0 : i32
    %c0_i32_1 = arith.constant 0 : i32
    return %arg1, %c0_i32, %c0_i32_0 : i32, i32, i32
  }
  func.func @transform_6(%arg0: i32, %arg1: i32) -> (i32, i32, i32) {
    %c0_i32 = arith.constant 0 : i32
    %c0_i32_0 = arith.constant 0 : i32
    %c0_i32_1 = arith.constant 0 : i32
    return %arg1, %c0_i32, %c0_i32_0 : i32, i32, i32
  }
  func.func @transform_7(%arg0: i32, %arg1: i32) -> (i32, i32, i32) {
    %c0_i32 = arith.constant 0 : i32
    %c0_i32_0 = arith.constant 0 : i32
    %c0_i32_1 = arith.constant 0 : i32
    return %arg1, %c0_i32, %c0_i32_0 : i32, i32, i32
  }
  func.func @transform_8(%arg0: i32, %arg1: i32) -> (i32, i32, i32) {
    %c0_i32 = arith.constant 0 : i32
    %c0_i32_0 = arith.constant 0 : i32
    %c0_i32_1 = arith.constant 0 : i32
    return %arg1, %c0_i32, %c0_i32_0 : i32, i32, i32
  }
  func.func @transform_9(%arg0: i32, %arg1: i32) -> (i32, i32, i32) {
    %c0_i32 = arith.constant 0 : i32
    %c0_i32_0 = arith.constant 0 : i32
    %c0_i32_1 = arith.constant 0 : i32
    return %arg1, %c0_i32, %c0_i32_0 : i32, i32, i32
  }
  func.func @transform_10(%arg0: i32, %arg1: i32) -> (i32, i32, i32) {
    %c0_i32 = arith.constant 0 : i32
    %c0_i32_0 = arith.constant 0 : i32
    %c0_i32_1 = arith.constant 0 : i32
    return %arg1, %c0_i32, %c0_i32_0 : i32, i32, i32
  }
  func.func @transform_11(%arg0: i32, %arg1: i32) -> (i32, i32, i32) {
    %c0_i32 = arith.constant 0 : i32
    %c0_i32_0 = arith.constant 0 : i32
    %c0_i32_1 = arith.constant 0 : i32
    return %arg1, %c0_i32, %c0_i32_0 : i32, i32, i32
  }
  func.func @transform_12(%arg0: i32, %arg1: i32) -> (i32, i32, i32) {
    %c0_i32 = arith.constant 0 : i32
    %c0_i32_0 = arith.constant 0 : i32
    %c0_i32_1 = arith.constant 0 : i32
    return %arg1, %c0_i32, %c0_i32_0 : i32, i32, i32
  }
  func.func @transform_13(%arg0: i32, %arg1: i32) -> (i32, i32, i32) {
    %c0_i32 = arith.constant 0 : i32
    %c0_i32_0 = arith.constant 0 : i32
    %c0_i32_1 = arith.constant 0 : i32
    return %arg1, %c0_i32, %c0_i32_0 : i32, i32, i32
  }
  func.func @transform_14(%arg0: i32, %arg1: i32) -> (i32, i32, i32) {
    %c0_i32 = arith.constant 0 : i32
    %c0_i32_0 = arith.constant 0 : i32
    %c0_i32_1 = arith.constant 0 : i32
    return %arg1, %c0_i32, %c0_i32_0 : i32, i32, i32
  }
  func.func @transform_15(%arg0: i32, %arg1: i32) -> (i32, i32, i32) {
    %c0_i32 = arith.constant 0 : i32
    %c0_i32_0 = arith.constant 0 : i32
    %c0_i32_1 = arith.constant 0 : i32
    return %arg1, %c0_i32, %c0_i32_0 : i32, i32, i32
  }
  func.func @transform_16(%arg0: i32, %arg1: i32) -> (i32, i32) {
    %c0_i32 = arith.constant 0 : i32
    %c0_i32_0 = arith.constant 0 : i32
    %c0_i32_1 = arith.constant 0 : i32
    return %c0_i32, %c0_i32_0 : i32, i32
  }
  func.func @transform_17(%arg0: i32, %arg1: i32) -> (i32, i32) {
    %c0_i32 = arith.constant 0 : i32
    %c0_i32_0 = arith.constant 0 : i32
    %c0_i32_1 = arith.constant 0 : i32
    return %c0_i32, %c0_i32_0 : i32, i32
  }
  func.func @transform_18(%arg0: i32, %arg1: i32) -> (i32, i32) {
    %c0_i32 = arith.constant 0 : i32
    %c0_i32_0 = arith.constant 0 : i32
    %c0_i32_1 = arith.constant 0 : i32
    return %c0_i32, %c0_i32_0 : i32, i32
  }
  func.func @transform_19(%arg0: i32, %arg1: i32) -> (i32, i32) {
    %c0_i32 = arith.constant 0 : i32
    %c0_i32_0 = arith.constant 0 : i32
    return %arg0, %c0_i32 : i32, i32
  }
}

</mosaic_0001>

<bundles_post_ra>
// kernel: tpu_custom_call.1
= control target key start
LH: loop header
LB: loop body
LE: loop exit
PB: predicated region body
PF: predicated region fallthrough
CT: control target
= control target key end

     0   :  { %s3537_s0 = inlined_call_operand.vmem [shape: f32[2,8,32], index: 0, kind: input, shape index: {}]   ;;  %s3538_s1 = inlined_call_operand.vmem [shape: f32[8,32], index: 1, kind: input, shape index: {}]   ;;  %s3539_s2 = inlined_call_operand.vmem [shape: s32[2,1], index: 2, kind: input, shape index: {}]   ;;  %s3540_s3 = inlined_call_operand.vmem [shape: f32[8,8], index: 3, kind: input, shape index: {}]   ;;  %s3541_s4 = inlined_call_operand.vmem [shape: f32[2,1,32], index: 4, kind: input, shape index: {}]   ;;  %s3542_s5 = inlined_call_operand.vmem [shape: f32[2,1,32], index: 5, kind: input, shape index: {}]   ;;  %s3543_s6 = inlined_call_operand.vmem [shape: bf16[2,32,96], index: 6, kind: input, shape index: {}]   ;;  %s3544_s7 = inlined_call_operand.vmem [shape: f32[2,1,96], index: 7, kind: input, shape index: {}]   ;;  %s3545_s8 = inlined_call_operand.vmem [shape: bf16[2,32,32], index: 8, kind: input, shape index: {}]   ;;  %s3546_s9 = inlined_call_operand.vmem [shape: f32[2,1,32], index: 9, kind: input, shape index: {}]   ;;  %s3547_s10 = inlined_call_operand.vmem [shape: f32[2,1,32], index: 10, kind: input, shape index: {}]   ;;  %s3548_s11 = inlined_call_operand.vmem [shape: f32[2,1,32], index: 11, kind: input, shape index: {}]   ;;  %s3549_s12 = inlined_call_operand.vmem [shape: bf16[2,32,128], index: 12, kind: input, shape index: {}]   ;;  %s3550_s13 = inlined_call_operand.vmem [shape: f32[2,1,128], index: 13, kind: input, shape index: {}]   ;;  %s3551_s14 = inlined_call_operand.vmem [shape: bf16[2,128,32], index: 14, kind: input, shape index: {}]   ;;  %s3552_s15 = inlined_call_operand.vmem [shape: f32[2,1,32], index: 15, kind: input, shape index: {}]   ;;  %s3553_s16 = inlined_call_operand.vmem [shape: f32[1,32], index: 16, kind: input, shape index: {}]   ;;  %s3554_s17 = inlined_call_operand.vmem [shape: f32[1,32], index: 17, kind: input, shape index: {}]   ;;  %s3555_s18 = inlined_call_operand.vmem [shape: bf16[32,32], index: 18, kind: input, shape index: {}]   ;;  %s3556_s19 = inlined_call_operand.hbm [shape: f32[2,32], index: 19, kind: output, shape index: {}]  }
   0x1   :  { %3561 = sst [smem:[#allocation10_spill]] %s3537_s0 }
   0x2   :  { %3562 = sst [smem:[#allocation11_spill]] %s3538_s1 }
   0x3   :  { %3563 = sst [smem:[#allocation12_spill]] %s3539_s2 }
   0x4   :  { %3564 = sst [smem:[#allocation13_spill]] %s3540_s3 }
   0x5   :  { %3565 = sst [smem:[#allocation14_spill]] %s3543_s6 }
   0x6   :  { %3566 = sst [smem:[#allocation15_spill]] %s3545_s8 }
   0x7   :  { %3567 = sst [smem:[#allocation16_spill]] %s3553_s16 }
   0x8   :  { %3568 = sst [smem:[#allocation17_spill]] %s3554_s17 }
   0x9   :  { %3569 = sst [smem:[#allocation18_spill]] %s3555_s18 }
   0xa   :  { %3570 = sst [smem:[#allocation19_spill]] %s3556_s19 }
   0xb   :  { %24 = vsyncpa [#allocation5], 0  ;;  %s3140_s0 = smov 0   ;;  %s3142_s30 = smov 0  }
   0xc   :  { %s3144_s20 = smov 0  }
   0xd LB: > { %3571 = sst [smem:[#allocation7_spill]] %s3014_s30  ;;  %s39_s1 = sadd.s32 1, %s3014_s30  ;;  %s3018_s20 = sphi %s3144_s20, %s30_s20   ;;  %s3014_s30 = sphi %s3142_s30, %s3594_s30   ;;  %s3010_s0 = sphi %s3140_s0, %s3593_s0  }
   0xe   : > { %3572 = sst [smem:[#allocation8_spill]] %s3018_s20  ;;  %p40_p0 = scmp.ge.s32.totalorder %s39_s1, 2 }
   0xf   : > { %p2571_p1 = scmp.ge.s32.totalorder %s3018_s20, 1  ;;  %p664_p2 = scmp.lt.s32.totalorder %s3018_s20, 3 }
  0x10   : > { %s3596_s1 = smov (%p40_p0, %s39_s1), 0 }
  0x11   : > { %3573 = sst [smem:[#allocation9_spill]] %s3596_s1  ;;  %p665_p3 = pnand %p2571_p1, %p664_p2 }
  0x12   : > { %p773_p4 = scmp.lt.s32.totalorder (!%p665_p3), %s3010_s0, 1  ;;  %s3574_s6 = sld [smem:[#allocation14_spill]] (!%p665_p3) }
  0x13   : > { %668 = sbr.rel (%p665_p3) target bundleno = 4879 (0x130f), region = 96  ;;  %s3575_s8 = sld [smem:[#allocation15_spill]] (!%p665_p3) }
  0x14   : > { %p2580_p5 = scmp.ne.s32.totalorder (!%p665_p3), %s3010_s0, 0 }
  0x18   : > { %s3163_s22 = scalar_select %p773_p4, %s3010_s0, 1 }
  0x19   : > { %s3576_s2 = sld [smem:[#allocation10_spill]] (!%p2580_p5) }
  0x1a   : > { %s2636_s27 = sshll.u32 %s3163_s22, 4  ;;  %s797_s16 = scalar_lea.vmem %s3547_s10, %s3163_s22 }
  0x1b   : > { %s3181_s1 = scalar_lea.vmem %s3574_s6, %s2636_s27  ;;  %s3186_s20 = scalar_lea.vmem %s3575_s8, %s2636_s27 }
  0x1c   : > { %s800_s21 = scalar_lea.vmem %s3548_s11, %s3163_s22  ;;  %s3203_s6 = scalar_lea.vmem %s3549_s12, %s2636_s27 }
  0x1d   : > { %s2639_s18 = sshll.u32 %s3163_s22, 6  ;;  %s816_s28 = scalar_lea.vmem %s3552_s15, %s3163_s22 }
  0x1e   : > { %s3213_s25 = scalar_lea.vmem %s3551_s14, %s2639_s18  ;;  %821 = sbr.rel (%p2580_p5) target bundleno = 41 (0x29), region = 100 }
  0x1f   : > { %s3577_s30 = sld [smem:[#allocation11_spill]] (!%p2580_p5) }
  0x23   : > { %v822_v0 = vld [vmem:[%s3576_s2] sm:$0xff]  ;;  %vm827_vm0 = vcmask 261120   ;;  %v823_v2 = vld [vmem:[%s3576_s2 + $0x8] sm:$0xff] }
  0x25   : > { %v824_v1 = vld [vmem:[%s3577_s30] sm:$0xff] }
  0x26   : > { %v825_v3 = vadd.f32 %v824_v1, %v822_v0  ;;  %v826_v4 = vadd.f32 %v824_v1, %v823_v2 }
  0x28   : > { %828 = vst.msk [vmem:[#allocation2] sm:$0xff] %vm827_vm0, %v825_v3  ;;  %829 = vst.msk [vmem:[#allocation2 + $0x8] sm:$0xff] %vm827_vm0, %v826_v4 }
  0x29 PF: > { %vm834_vm1 = vcmask 261120   ;;  %v2901_v19 = vld [vmem:[%s3181_s1 + $0x8] sm:$0xff]   ;;  %v3020_v20 = vmov 0.0   ;;  %vm3021_vm2 = vmmov 0   ;;  %v2902_v21 = vld [vmem:[%s3181_s1] sm:$0xff]   ;;  %s3578_s1 = scalar_lea.vmem %s3541_s4, %s3163_s22  ;;  %s3579_s3 = scalar_lea.vmem %s3542_s5, %s3163_s22  ;;  %vm956_vm3 = vcmask 64512  }
  0x2a   : > { %2696 = vmatprep.subr.bf16.mxu0 %v3020_v20  ;;  %2700 = vmatprep.mubr.msk.bf16.mxu0 %vm3021_vm2, %v3020_v20  ;;  %v2581_v30 = vld [vmem:[%s3578_s1] ss:$0 sm:$0xff]  ;;  %s3580_s23 = scalar_lea.vmem %s3544_s7, %s3163_s22  ;;  %s3022_s19 = smov 96   ;;  %vm1081_vm4 = vcmask 1043456   ;;  %vm1405_vm5 = vcmask 130112   ;;  %vm1636_vm6 = vcmask 195712  }
  0x2b   : > { %2697 = vmatpush3.bf16.msra.mxu0 %v2901_v19  ;;  %2716 = vmatprep.subr.bf16.mxu1 %v3020_v20  ;;  %v2582_v34 = vld [vmem:[%s3579_s3] ss:$0 sm:$0xff]  ;;  %s3581_s8 = sld [smem:[#allocation13_spill]]  ;;  %s3023_s18 = smov 64   ;;  %vm1867_vm7 = vcmask 261312  }
  0x2c   : > { %2698 = vmatprep.subr.bf16.mxu0 %v3020_v20  ;;  %2718 = vmatprep.mubr.msk.bf16.mxu1 %vm3021_vm2, %v3020_v20  ;;  %v2583_v39 = vld [vmem:[%s3580_s23] ss:$0 sm:$0xff]  ;;  %s3024_s1 = smov 88   ;;  %s3025_s24 = smov 120  }
  0x2d   : > { %s3026_s26 = smov 56   ;;  %s3027_s3 = smov 80  }
  0x2e   : > { %s3028_s29 = smov 112   ;;  %s3029_s27 = smov 48  }
  0x2f   : > { %v3229_v5 = vld [vmem:[#allocation2] sm:$0xff]  ;;  %v3231_v6 = vld [vmem:[#allocation2 + $0x8] sm:$0xff]  ;;  %2699 = vmatpush3.bf16.msra.mxu0 %v2902_v21  ;;  %s3030_s23 = smov 72   ;;  %s3032_s30 = smov 40  }
  0x30   : > { %v835_v7 = vsel %vm834_vm1, %v3229_v5, 0.0  ;;  %v838_v8 = vsel %vm834_vm1, %v3231_v6, 0.0  ;;  %2704 = vmatprep.subr.bf16.mxu0 %v3020_v20  ;;  %s3033_s17 = smov 8   ;;  %p2624_p6 = scmp.ne.s32.totalorder %s3010_s0, 1 }
  0x31   : > { %836 = vadd.xlane.f32.xlu0 %v835_v7  ;;  %v3294_v56 = vld [vmem:[%s3581_s8] sm:$0xff]  ;;  %s3034_s8 = smov 16  }
  0x35   : > { %839 = vadd.xlane.f32.xlu0 %v838_v8 }
  0xba   : > { %v837_v9 = vpop.xlane.xlu0 %836 }
  0xbb   : > { %v842_v10 = vmul.f32 0.03125, %v837_v9 }
  0xbd   : > { %v844_v11 = vsub.f32 %v3229_v5, %v842_v10 }
  0xbe   : > { %v840_v12 = vpop.xlane.xlu0 %839 }
  0xbf   : > { %v843_v13 = vmul.f32 0.03125, %v840_v12  ;;  %v846_v14 = vmul.f32 %v844_v11, %v844_v11 }
  0xc1   : > { %v845_v15 = vsub.f32 %v3231_v6, %v843_v13  ;;  %v848_v16 = vsel %vm834_vm1, %v846_v14, 0.0 }
  0xc2   : > { %849 = vadd.xlane.f32.xlu1 %v848_v16 }
  0xc3   : > { %v847_v17 = vmul.f32 %v845_v15, %v845_v15 }
  0xc5   : > { %v851_v18 = vsel %vm834_vm1, %v847_v17, 0.0 }
  0xc6   : > { %852 = vadd.xlane.f32.xlu1 %v851_v18 }
 0x14b   : > { %v850_v22 = vpop.xlane.xlu1 %849 }
 0x14c   : > { %v854_v23 = vmul.f32 0.03125, %v850_v22 }
 0x14e   : > { %v856_v24 = vadd.f32 1e-05, %v854_v23 }
 0x14f   : > { %v853_v25 = vpop.xlane.xlu1 %852 }
 0x150   : > { %2915 = vrsqrt.f32 %v856_v24  ;;  %v855_v26 = vmul.f32 0.03125, %v853_v25 }
 0x152   : > { %v857_v27 = vadd.f32 1e-05, %v855_v26 }
 0x154   : > { %2917 = vrsqrt.f32 %v857_v27 }
 0x15d   : > { %v2916_v28 = vpop.eup %2915 }
 0x15e   : > { %v860_v29 = vmul.f32 %v2916_v28, %v844_v11 }
 0x160   : > { %v868_v33 = vmul.f32 %v2581_v30, %v860_v29 }
 0x161   : > { %v2918_v31 = vpop.eup %2917 }
 0x162   : > { %v861_v32 = vmul.f32 %v2918_v31, %v845_v15  ;;  %v876_v36 = vadd.f32 %v2582_v34, %v868_v33 }
 0x164   : > { %v869_v35 = vmul.f32 %v2581_v30, %v861_v32 }
 0x166   : > { %v877_v37 = vadd.f32 %v2582_v34, %v869_v35 }
 0x168   : > { %v878_v38 = vpack.c.bf16 %v877_v37, %v876_v36 }
 0x16a   : > { %2701 = vmatmul.mubr.msk.bf16.vlgmr.msra.gmra.mxu0 %vm834_vm1, %v878_v38 }
 0x16b   : > { %2706 = vmatprep.mubr.msk.bf16.mxu0 %vm3021_vm2, %v3020_v20 }
 0x22a   : > { %v939_v40 = vpop.f32.mrf.mxu0 }
 0x22b   : > { %v940_v41 = vadd.f32 %v2583_v39, %v939_v40 }
 0x22c   : > { %v2702_v42 = vpop.f32.mrf.mxu0 }
 0x22d   : > { %v3269_v43 = vpack.c.bf16 %v940_v41, %v940_v41  ;;  %v947_v50 = vmul.f32 0.35355338, %v940_v41 }
 0x22e   : > { %v942_v44 = vpop.f32.mrf.mxu0 }
 0x22f   : > { %v943_v45 = vadd.f32 %v2583_v39, %v942_v44  ;;  %954 = vrot.lane.b32.xlu0 %v3269_v43, %s3022_s19  ;;  %v3277_v52 = vpack.c.bf16 %v947_v50, %v947_v50 }
 0x230   : > { %v2703_v46 = vpop.f32.mrf.mxu0 }
 0x231   : > { %v3272_v47 = vpack.c.bf16 %v943_v45, %v943_v45  ;;  %v948_v54 = vmul.f32 0.35355338, %v943_v45 }
 0x233   : > { %1004 = vrot.lane.b32.xlu1 %v3272_v47, %s3022_s19  ;;  %v3285_v55 = vpack.c.bf16 %v948_v54, %v948_v54  ;;  %s3031_s19 = smov 104  }
 0x2a1   : > { %v955_v48 = vpop.permute.xlu0 %954 }
 0x2a2   : > { %v961_v49 = vsel %vm956_vm3, %v955_v48, 0 }
 0x2a3   : > { %2705 = vmatpush3.bf16.xpose.msra.mxu0 %v961_v49 }
 0x2a4   : > { %2710 = vmatprep.subr.bf16.mxu0 %v3020_v20 }
 0x2a5   : > { %v1005_v51 = vpop.permute.xlu1 %1004 }
 0x2a6   : > { %v1010_v53 = vsel %vm956_vm3, %v1005_v51, 0 }
 0x2aa   : > { %2707 = vmatmul.mubr.msk.bf16.vlgmr.msra.gmra.mxu0 %vm956_vm3, %v3277_v52 }
 0x2ab   : > { %2711 = vmatpush3.bf16.xpose.msra.mxu0 %v1010_v53  ;;  %2712 = vmatprep.mubr.msk.bf16.mxu0 %vm3021_vm2, %v3020_v20 }
 0x2ac   : > { %2722 = vmatprep.subr.bf16.mxu0 %v3020_v20 }
 0x2b2   : > { %2713 = vmatmul.mubr.msk.bf16.vlgmr.msra.gmra.mxu0 %vm956_vm3, %v3285_v55 }
 0x2b3   : > { %2724 = vmatprep.mubr.msk.bf16.mxu0 %vm3021_vm2, %v3020_v20 }
 0x36a   : > { %v997_v57 = vpop.f32.mrf.mxu0 }
 0x36b   : > { %v998_v58 = vadd.f32 %v997_v57, %v3294_v56 }
 0x36c   : > { %v2708_v59 = vpop.f32.mrf.mxu0 }
 0x36d   : > { %v1052_v60 = vsel %vm956_vm3, %v998_v58, -inf }
 0x36e   : > { %1053 = vmax.xlane.f32.xlu1 %v1052_v60  ;;  %v1000_v61 = vpop.f32.mrf.mxu0 }
 0x370   : > { %v2709_v62 = vpop.f32.mrf.mxu0 }
 0x372   : > { %v1046_v63 = vpop.f32.mrf.mxu0 }
 0x373   : > { %v1047_v0 = vadd.f32 %v1046_v63, %v3294_v56 }
 0x374   : > { %v2714_v1 = vpop.f32.mrf.mxu0 }
 0x375   : > { %v1055_v2 = vsel %vm956_vm3, %v1047_v0, -inf }
 0x376   : > { %1056 = vmax.xlane.f32.xlu0 %v1055_v2  ;;  %v1049_v3 = vpop.f32.mrf.mxu0 }
 0x378   : > { %v2715_v4 = vpop.f32.mrf.mxu0 }
 0x37f   : > { %1125 = vrot.lane.b32.xlu1 %v3272_v47, %s3023_s18 }
 0x383   : > { %1178 = vrot.lane.b32.xlu1 %v3269_v43, %s3024_s1 }
 0x3f7   : > { %v1054_v7 = vpop.xlane.xlu1 %1053 }
 0x3f8   : > { %v1058_v8 = vsub.f32 %v998_v58, %v1054_v7 }
 0x3fa   : > { %v1060_v9 = vmul.f32 1.442695, %v1058_v8 }
 0x3fb   : > { %v1126_v10 = vpop.permute.xlu1 %1125 }
 0x3fc   : > { %2919 = vpow2.f32 %v1060_v9  ;;  %v1131_v11 = vsel %vm1081_vm4, %v1126_v10, 0 }
 0x3fd   : > { %2723 = vmatpush3.bf16.msra.mxu0 %v1131_v11 }
 0x3fe   : > { %2734 = vmatprep.subr.bf16.mxu0 %v3020_v20 }
 0x3ff   : > { %v1057_v12 = vpop.xlane.xlu0 %1056  ;;  %v1179_v21 = vpop.permute.xlu1 %1178 }
 0x400   : > { %v1059_v13 = vsub.f32 %v1047_v0, %v1057_v12  ;;  %v1184_v28 = vsel %vm956_vm3, %v1179_v21, 0 }
 0x402   : > { %v1062_v14 = vmul.f32 1.442695, %v1059_v13 }
 0x404   : > { %2921 = vpow2.f32 %v1062_v14 }
 0x409   : > { %v2920_v15 = vpop.eup %2919 }
 0x40a   : > { %v1064_v16 = vsel %vm956_vm3, %v2920_v15, 0.0 }
 0x40b   : > { %1065 = vadd.xlane.f32.xlu0 %v1064_v16 }
 0x411   : > { %v2922_v17 = vpop.eup %2921 }
 0x412   : > { %v1067_v18 = vsel %vm956_vm3, %v2922_v17, 0.0 }
 0x413   : > { %1068 = vadd.xlane.f32.xlu1 %v1067_v18 }
 0x421   : > { %1076 = vrot.lane.b32.xlu0 %v3269_v43, %s3023_s18  ;;  %s3035_s18 = smov 24  }
 0x424   : > { %1229 = vrot.lane.b32.xlu1 %v3272_v47, %s3024_s1 }
 0x425   : > { %1176 = vrot.lane.b32.xlu0 %v3277_v52, %s3025_s24 }
 0x428   : > { %1227 = vrot.lane.b32.xlu1 %v3285_v55, %s3025_s24  ;;  %s3582_s24 = scalar_lea.vmem %s3546_s9, %s3163_s22 }
 0x494   : > { %v1066_v19 = vpop.xlane.xlu0 %1065 }
 0x495   : > { %2923 = vrcp.f32 %v1066_v19 }
 0x498   : > { %v1077_v22 = vpop.permute.xlu0 %1076 }
 0x499   : > { %v1083_v23 = vsel %vm1081_vm4, %v1077_v22, 0 }
 0x49a   : > { %2717 = vmatpush3.bf16.msra.mxu1 %v1083_v23 }
 0x49b   : > { %2728 = vmatprep.subr.bf16.mxu1 %v3020_v20 }
 0x49c   : > { %v1069_v24 = vpop.xlane.xlu1 %1068  ;;  %v1177_v33 = vpop.permute.xlu0 %1176 }
 0x49d   : > { %2925 = vrcp.f32 %v1069_v24 }
 0x4a0   : > { %v1230_v31 = vpop.permute.xlu1 %1229 }
 0x4a1   : > { %v1235_v34 = vsel %vm956_vm3, %v1230_v31, 0 }
 0x4a2   : > { %v2924_v25 = vpop.eup %2923 }
 0x4a3   : > { %v1072_v26 = vmul.f32 %v2924_v25, %v2920_v15 }
 0x4a4   : > { %v1228_v35 = vpop.permute.xlu1 %1227 }
 0x4a5   : > { %v1074_v27 = vpack.c.bf16 %v1072_v26, %v1072_v26 }
 0x4a7   : > { %2719 = vmatmul.mubr.msk.bf16.vlgmr.msra.gmra.mxu1 %vm956_vm3, %v1074_v27 }
 0x4a8   : > { %2729 = vmatpush3.bf16.xpose.msra.mxu1 %v1184_v28  ;;  %2730 = vmatprep.mubr.msk.bf16.mxu1 %vm3021_vm2, %v3020_v20 }
 0x4a9   : > { %2740 = vmatprep.subr.bf16.mxu1 %v3020_v20 }
 0x4aa   : > { %v2926_v29 = vpop.eup %2925 }
 0x4ab   : > { %v1073_v30 = vmul.f32 %v2926_v29, %v2922_v17 }
 0x4ad   : > { %v1075_v32 = vpack.c.bf16 %v1073_v30, %v1073_v30 }
 0x4af   : > { %2725 = vmatmul.mubr.msk.bf16.vlgmr.msra.gmra.mxu0 %vm956_vm3, %v1075_v32  ;;  %2731 = vmatmul.mubr.msk.bf16.vlgmr.msra.gmra.mxu1 %vm956_vm3, %v1177_v33 }
 0x4b0   : > { %2735 = vmatpush3.bf16.xpose.msra.mxu0 %v1235_v34  ;;  %2736 = vmatprep.mubr.msk.bf16.mxu0 %vm3021_vm2, %v3020_v20 }
 0x4b1   : > { %2746 = vmatprep.subr.bf16.mxu0 %v3020_v20  ;;  %2742 = vmatprep.mubr.msk.bf16.mxu1 %vm3021_vm2, %v3020_v20 }
 0x4b7   : > { %2737 = vmatmul.mubr.msk.bf16.vlgmr.msra.gmra.mxu0 %vm956_vm3, %v1228_v35 }
 0x4b8   : > { %2748 = vmatprep.mubr.msk.bf16.mxu0 %vm3021_vm2, %v3020_v20 }
 0x567   : > { %v1119_v36 = vpop.f32.mrf.mxu1 }
 0x568   : > { %1173 = vst.msk [vmem:[#allocation3] sm:$0xff] %vm956_vm3, %v1119_v36 }
 0x569   : > { %v2720_v37 = vpop.f32.mrf.mxu1 }
 0x56b   : > { %v1122_v38 = vpop.f32.mrf.mxu1 }
 0x56d   : > { %v2721_v39 = vpop.f32.mrf.mxu1 }
 0x56f   : > { %v1167_v40 = vpop.f32.mrf.mxu0  ;;  %v1220_v41 = vpop.f32.mrf.mxu1 }
 0x570   : > { %1174 = vst.msk [vmem:[#allocation3 + $0x8] sm:$0xff] %vm956_vm3, %v1167_v40  ;;  %v1221_v42 = vadd.f32 %v1220_v41, %v3294_v56 }
 0x571   : > { %v2726_v44 = vpop.f32.mrf.mxu0  ;;  %v2732_v45 = vpop.f32.mrf.mxu1 }
 0x572   : > { %v1277_v46 = vsel %vm956_vm3, %v1221_v42, -inf }
 0x573   : > { %1278 = vmax.xlane.f32.xlu0 %v1277_v46  ;;  %v1170_v48 = vpop.f32.mrf.mxu0  ;;  %v1223_v49 = vpop.f32.mrf.mxu1 }
 0x575   : > { %v2727_v50 = vpop.f32.mrf.mxu0  ;;  %v2733_v51 = vpop.f32.mrf.mxu1 }
 0x577   : > { %v1271_v53 = vpop.f32.mrf.mxu0 }
 0x578   : > { %v1272_v54 = vadd.f32 %v1271_v53, %v3294_v56 }
 0x579   : > { %v2738_v57 = vpop.f32.mrf.mxu0 }
 0x57a   : > { %v1280_v58 = vsel %vm956_vm3, %v1272_v54, -inf }
 0x57b   : > { %1281 = vmax.xlane.f32.xlu1 %v1280_v58  ;;  %v1274_v59 = vpop.f32.mrf.mxu0 }
 0x57d   : > { %v2739_v60 = vpop.f32.mrf.mxu0 }
 0x58c   : > { %1349 = vrot.lane.b32.xlu1 %v3272_v47, %s3026_s26 }
 0x590   : > { %1410 = vrot.lane.b32.xlu1 %v3269_v43, %s3027_s3 }
 0x594   : > { %1460 = vrot.lane.b32.xlu1 %v3272_v47, %s3027_s3 }
 0x598   : > { %1458 = vrot.lane.b32.xlu1 %v3285_v55, %s3028_s29 }
 0x5fc   : > { %v1279_v61 = vpop.xlane.xlu0 %1278 }
 0x5fd   : > { %v1283_v62 = vsub.f32 %v1221_v42, %v1279_v61 }
 0x5ff   : > { %v1285_v63 = vmul.f32 1.442695, %v1283_v62 }
 0x601   : > { %2927 = vpow2.f32 %v1285_v63 }
 0x604   : > { %v1282_v0 = vpop.xlane.xlu1 %1281 }
 0x605   : > { %v1284_v1 = vsub.f32 %v1272_v54, %v1282_v0 }
 0x607   : > { %v1287_v2 = vmul.f32 1.442695, %v1284_v1 }
 0x608   : > { %v1350_v3 = vpop.permute.xlu1 %1349 }
 0x609   : > { %2929 = vpow2.f32 %v1287_v2  ;;  %v1355_v4 = vsel %vm1081_vm4, %v1350_v3, 0 }
 0x60a   : > { %2747 = vmatpush3.bf16.msra.mxu0 %v1355_v4 }
 0x60b   : > { %2758 = vmatprep.subr.bf16.mxu0 %v3020_v20 }
 0x60c   : > { %v1411_v17 = vpop.permute.xlu1 %1410 }
 0x60d   : > { %v1416_v19 = vsel %vm956_vm3, %v1411_v17, 0 }
 0x60e   : > { %v2928_v7 = vpop.eup %2927 }
 0x60f   : > { %v1289_v8 = vsel %vm956_vm3, %v2928_v7, 0.0 }
 0x610   : > { %1290 = vadd.xlane.f32.xlu0 %v1289_v8  ;;  %v1461_v23 = vpop.permute.xlu1 %1460 }
 0x611   : > { %v1466_v26 = vsel %vm956_vm3, %v1461_v23, 0 }
 0x614   : > { %v1459_v27 = vpop.permute.xlu1 %1458 }
 0x616   : > { %v2930_v9 = vpop.eup %2929 }
 0x617   : > { %v1292_v10 = vsel %vm956_vm3, %v2930_v9, 0.0 }
 0x618   : > { %1293 = vadd.xlane.f32.xlu0 %v1292_v10 }
 0x62e   : > { %1301 = vrot.lane.b32.xlu0 %v3269_v43, %s3026_s26 }
 0x632   : > { %1408 = vrot.lane.b32.xlu0 %v3277_v52, %s3028_s29 }
 0x699   : > { %v1291_v11 = vpop.xlane.xlu0 %1290 }
 0x69a   : > { %2931 = vrcp.f32 %v1291_v11 }
 0x6a1   : > { %v1294_v12 = vpop.xlane.xlu0 %1293 }
 0x6a2   : > { %2933 = vrcp.f32 %v1294_v12 }
 0x6a5   : > { %v1302_v13 = vpop.permute.xlu0 %1301 }
 0x6a6   : > { %v1307_v14 = vsel %vm1081_vm4, %v1302_v13, 0 }
 0x6a7   : > { %v2932_v15 = vpop.eup %2931  ;;  %2741 = vmatpush3.bf16.msra.mxu1 %v1307_v14 }
 0x6a8   : > { %2752 = vmatprep.subr.bf16.mxu1 %v3020_v20  ;;  %v1297_v16 = vmul.f32 %v2932_v15, %v2928_v7 }
 0x6a9   : > { %v1409_v25 = vpop.permute.xlu0 %1408 }
 0x6aa   : > { %v1299_v18 = vpack.c.bf16 %v1297_v16, %v1297_v16 }
 0x6ac   : > { %2743 = vmatmul.mubr.msk.bf16.vlgmr.msra.gmra.mxu1 %vm956_vm3, %v1299_v18 }
 0x6ad   : > { %2753 = vmatpush3.bf16.xpose.msra.mxu1 %v1416_v19  ;;  %2754 = vmatprep.mubr.msk.bf16.mxu1 %vm3021_vm2, %v3020_v20 }
 0x6ae   : > { %2764 = vmatprep.subr.bf16.mxu1 %v3020_v20 }
 0x6af   : > { %v2934_v21 = vpop.eup %2933 }
 0x6b0   : > { %v1298_v22 = vmul.f32 %v2934_v21, %v2930_v9 }
 0x6b2   : > { %v1300_v24 = vpack.c.bf16 %v1298_v22, %v1298_v22 }
 0x6b4   : > { %2749 = vmatmul.mubr.msk.bf16.vlgmr.msra.gmra.mxu0 %vm956_vm3, %v1300_v24  ;;  %2755 = vmatmul.mubr.msk.bf16.vlgmr.msra.gmra.mxu1 %vm956_vm3, %v1409_v25 }
 0x6b5   : > { %2759 = vmatpush3.bf16.xpose.msra.mxu0 %v1466_v26  ;;  %2760 = vmatprep.mubr.msk.bf16.mxu0 %vm3021_vm2, %v3020_v20 }
 0x6b6   : > { %2770 = vmatprep.subr.bf16.mxu0 %v3020_v20  ;;  %2766 = vmatprep.mubr.msk.bf16.mxu1 %vm3021_vm2, %v3020_v20 }
 0x6bc   : > { %2761 = vmatmul.mubr.msk.bf16.vlgmr.msra.gmra.mxu0 %vm956_vm3, %v1459_v27 }
 0x6bd   : > { %2772 = vmatprep.mubr.msk.bf16.mxu0 %vm3021_vm2, %v3020_v20 }
 0x76c   : > { %v3362_v28 = vpop.f32.mrf.mxu1 }
 0x76e   : > { %v2744_v29 = vpop.f32.mrf.mxu1 }
 0x770   : > { %v1346_v30 = vpop.f32.mrf.mxu1 }
 0x772   : > { %v2745_v31 = vpop.f32.mrf.mxu1 }
 0x774   : > { %v3364_v32 = vpop.f32.mrf.mxu0  ;;  %v1452_v33 = vpop.f32.mrf.mxu1 }
 0x775   : > { %v1453_v34 = vadd.f32 %v1452_v33, %v3294_v56 }
 0x776   : > { %v2750_v35 = vpop.f32.mrf.mxu0  ;;  %v2756_v36 = vpop.f32.mrf.mxu1 }
 0x777   : > { %v1508_v37 = vsel %vm956_vm3, %v1453_v34, -inf }
 0x778   : > { %1509 = vmax.xlane.f32.xlu0 %v1508_v37  ;;  %v1394_v38 = vpop.f32.mrf.mxu0  ;;  %v1455_v39 = vpop.f32.mrf.mxu1 }
 0x77a   : > { %v2751_v40 = vpop.f32.mrf.mxu0  ;;  %v2757_v41 = vpop.f32.mrf.mxu1 }
 0x77c   : > { %v1502_v42 = vpop.f32.mrf.mxu0 }
 0x77d   : > { %v1503_v44 = vadd.f32 %v1502_v42, %v3294_v56 }
 0x77e   : > { %v2762_v45 = vpop.f32.mrf.mxu0 }
 0x77f   : > { %v1511_v46 = vsel %vm956_vm3, %v1503_v44, -inf }
 0x780   : > { %1512 = vmax.xlane.f32.xlu1 %v1511_v46  ;;  %v1505_v48 = vpop.f32.mrf.mxu0 }
 0x782   : > { %v2763_v49 = vpop.f32.mrf.mxu0 }
 0x791   : > { %1580 = vrot.lane.b32.xlu1 %v3272_v47, %s3029_s27 }
 0x795   : > { %1641 = vrot.lane.b32.xlu1 %v3269_v43, %s3030_s23 }
 0x799   : > { %1691 = vrot.lane.b32.xlu1 %v3272_v47, %s3030_s23 }
 0x79d   : > { %1689 = vrot.lane.b32.xlu1 %v3285_v55, %s3031_s19 }
 0x801   : > { %v1510_v50 = vpop.xlane.xlu0 %1509 }
 0x802   : > { %v1514_v51 = vsub.f32 %v1453_v34, %v1510_v50 }
 0x804   : > { %v1516_v53 = vmul.f32 1.442695, %v1514_v51 }
 0x806   : > { %2935 = vpow2.f32 %v1516_v53 }
 0x809   : > { %v1513_v54 = vpop.xlane.xlu1 %1512 }
 0x80a   : > { %v1515_v57 = vsub.f32 %v1503_v44, %v1513_v54 }
 0x80c   : > { %v1518_v58 = vmul.f32 1.442695, %v1515_v57 }
 0x80d   : > { %v1581_v59 = vpop.permute.xlu1 %1580 }
 0x80e   : > { %2937 = vpow2.f32 %v1518_v58  ;;  %v1586_v60 = vsel %vm1081_vm4, %v1581_v59, 0 }
 0x80f   : > { %2771 = vmatpush3.bf16.msra.mxu0 %v1586_v60 }
 0x810   : > { %2782 = vmatprep.subr.bf16.mxu0 %v3020_v20 }
 0x811   : > { %v1642_v8 = vpop.permute.xlu1 %1641 }
 0x812   : > { %v1647_v10 = vsel %vm956_vm3, %v1642_v8, 0 }
 0x813   : > { %v2936_v61 = vpop.eup %2935 }
 0x814   : > { %v1520_v62 = vsel %vm956_vm3, %v2936_v61, 0.0 }
 0x815   : > { %1521 = vadd.xlane.f32.xlu0 %v1520_v62  ;;  %v1692_v12 = vpop.permute.xlu1 %1691 }
 0x816   : > { %v1697_v15 = vsel %vm956_vm3, %v1692_v12, 0 }
 0x819   : > { %v1690_v16 = vpop.permute.xlu1 %1689 }
 0x81b   : > { %v2938_v63 = vpop.eup %2937 }
 0x81c   : > { %v1523_v55 = vsel %vm956_vm3, %v2938_v63, 0.0 }
 0x81d   : > { %1524 = vadd.xlane.f32.xlu0 %v1523_v55 }
 0x833   : > { %1532 = vrot.lane.b32.xlu0 %v3269_v43, %s3029_s27  ;;  %s3583_s27 = scalar_lea.vmem %s3550_s13, %s3163_s22 }
 0x837   : > { %1639 = vrot.lane.b32.xlu0 %v3277_v52, %s3031_s19  ;;  %s3584_s19 = sld [smem:[#allocation12_spill]] (!%p2624_p6) }
 0x89e   : > { %v1522_v0 = vpop.xlane.xlu0 %1521 }
 0x89f   : > { %2939 = vrcp.f32 %v1522_v0 }
 0x8a6   : > { %v1525_v1 = vpop.xlane.xlu0 %1524 }
 0x8a7   : > { %2941 = vrcp.f32 %v1525_v1  ;;  %v2903_v1 = vld [vmem:[%s3186_s20 + $0x8] sm:$0xff]  }
 0x8aa   : > { %v1533_v2 = vpop.permute.xlu0 %1532 }
 0x8ab   : > { %v1538_v3 = vsel %vm1081_vm4, %v1533_v2, 0  ;;  %v2904_v2 = vld [vmem:[%s3186_s20] sm:$0xff]  }
 0x8ac   : > { %v2940_v4 = vpop.eup %2939  ;;  %2765 = vmatpush3.bf16.msra.mxu1 %v1538_v3 }
 0x8ad   : > { %2776 = vmatprep.subr.bf16.mxu1 %v3020_v20  ;;  %v1528_v7 = vmul.f32 %v2940_v4, %v2936_v61 }
 0x8ae   : > { %v1640_v14 = vpop.permute.xlu0 %1639 }
 0x8af   : > { %v1530_v9 = vpack.c.bf16 %v1528_v7, %v1528_v7 }
 0x8b1   : > { %2767 = vmatmul.mubr.msk.bf16.vlgmr.msra.gmra.mxu1 %vm956_vm3, %v1530_v9 }
 0x8b2   : > { %2777 = vmatpush3.bf16.xpose.msra.mxu1 %v1647_v10  ;;  %2778 = vmatprep.mubr.msk.bf16.mxu1 %vm3021_vm2, %v3020_v20 }
 0x8b3   : > { %2788 = vmatprep.subr.bf16.mxu1 %v3020_v20 }
 0x8b4   : > { %v2942_v52 = vpop.eup %2941 }
 0x8b5   : > { %v1529_v11 = vmul.f32 %v2942_v52, %v2938_v63 }
 0x8b7   : > { %v1531_v13 = vpack.c.bf16 %v1529_v11, %v1529_v11 }
 0x8b9   : > { %2773 = vmatmul.mubr.msk.bf16.vlgmr.msra.gmra.mxu0 %vm956_vm3, %v1531_v13  ;;  %2779 = vmatmul.mubr.msk.bf16.vlgmr.msra.gmra.mxu1 %vm956_vm3, %v1640_v14 }
 0x8ba   : > { %2783 = vmatpush3.bf16.xpose.msra.mxu0 %v1697_v15  ;;  %2784 = vmatprep.mubr.msk.bf16.mxu0 %vm3021_vm2, %v3020_v20 }
 0x8bb   : > { %2794 = vmatprep.subr.bf16.mxu0 %v3020_v20  ;;  %2790 = vmatprep.mubr.msk.bf16.mxu1 %vm3021_vm2, %v3020_v20 }
 0x8c1   : > { %2785 = vmatmul.mubr.msk.bf16.vlgmr.msra.gmra.mxu0 %vm956_vm3, %v1690_v16 }
 0x8c2   : > { %2796 = vmatprep.mubr.msk.bf16.mxu0 %vm3021_vm2, %v3020_v20 }
 0x971   : > { %v1574_v17 = vpop.f32.mrf.mxu1 }
 0x973   : > { %v2768_v18 = vpop.f32.mrf.mxu1 }
 0x975   : > { %v1577_v19 = vpop.f32.mrf.mxu1 }
 0x977   : > { %v2769_v21 = vpop.f32.mrf.mxu1 }
 0x979   : > { %v1622_v22 = vpop.f32.mrf.mxu0  ;;  %v1683_v23 = vpop.f32.mrf.mxu1 }
 0x97a   : > { %v1684_v24 = vadd.f32 %v1683_v23, %v3294_v56 }
 0x97b   : > { %v2774_v25 = vpop.f32.mrf.mxu0  ;;  %v2780_v26 = vpop.f32.mrf.mxu1 }
 0x97c   : > { %v1739_v27 = vsel %vm956_vm3, %v1684_v24, -inf }
 0x97d   : > { %1740 = vmax.xlane.f32.xlu0 %v1739_v27  ;;  %v1625_v29 = vpop.f32.mrf.mxu0  ;;  %v1686_v30 = vpop.f32.mrf.mxu1 }
 0x97f   : > { %v2775_v31 = vpop.f32.mrf.mxu0  ;;  %v2781_v33 = vpop.f32.mrf.mxu1 }
 0x981   : > { %v1733_v34 = vpop.f32.mrf.mxu0 }
 0x982   : > { %v1734_v35 = vadd.f32 %v1733_v34, %v3294_v56 }
 0x983   : > { %v2786_v36 = vpop.f32.mrf.mxu0 }
 0x984   : > { %v1742_v37 = vsel %vm956_vm3, %v1734_v35, -inf }
 0x985   : > { %1743 = vmax.xlane.f32.xlu1 %v1742_v37  ;;  %v1736_v38 = vpop.f32.mrf.mxu0 }
 0x987   : > { %v2787_v39 = vpop.f32.mrf.mxu0 }
 0x988   : > { %v2905_v39 = vld [vmem:[%s3203_s6 + $0x8] sm:$0xff]  }
 0x996   : > { %1811 = vrot.lane.b32.xlu1 %v3272_v47, %s3032_s30 }
 0x99a   : > { %1399 = vrot.lane.b32.xlu1 %v3362_v28, %s3033_s17 }
 0x99e   : > { %1401 = vrot.lane.b32.xlu1 %v3364_v32, %s3033_s17  ;;  %s3585_s17 = sld [smem:[#allocation18_spill]] (!%p2624_p6) }
 0x9a2   : > { %1632 = vrot.lane.b32.xlu1 %v1622_v22, %s3034_s8 }
 0xa06   : > { %v1741_v40 = vpop.xlane.xlu0 %1740 }
 0xa07   : > { %v1745_v41 = vsub.f32 %v1684_v24, %v1741_v40  ;;  %v2906_v40 = vld [vmem:[%s3203_s6] sm:$0xff]   ;;  %s3587_s6 = sld [smem:[#allocation17_spill]] (!%p2624_p6) }
 0xa09   : > { %v1747_v56 = vmul.f32 1.442695, %v1745_v41 }
 0xa0b   : > { %2943 = vpow2.f32 %v1747_v56 }
 0xa0e   : > { %v1744_v42 = vpop.xlane.xlu1 %1743 }
 0xa0f   : > { %v1746_v44 = vsub.f32 %v1734_v35, %v1744_v42 }
 0xa11   : > { %v1749_v45 = vmul.f32 1.442695, %v1746_v44 }
 0xa12   : > { %v1812_v46 = vpop.permute.xlu1 %1811 }
 0xa13   : > { %2945 = vpow2.f32 %v1749_v45  ;;  %v1817_v48 = vsel %vm1081_vm4, %v1812_v46, 0 }
 0xa14   : > { %2795 = vmatpush3.bf16.msra.mxu0 %v1817_v48 }
 0xa15   : > { %2808 = vmatprep.subr.bf16.mxu0 %v3020_v20 }
 0xa16   : > { %v1400_v47 = vpop.permute.xlu1 %1399 }
 0xa17   : > { %1406 = vst.msk [vmem:[#allocation3] sm:$0xff] %vm1405_vm5, %v1400_v47 }
 0xa18   : > { %v2944_v28 = vpop.eup %2943 }
 0xa19   : > { %v1751_v32 = vsel %vm956_vm3, %v2944_v28, 0.0 }
 0xa1a   : > { %1752 = vadd.xlane.f32.xlu0 %v1751_v32  ;;  %v1402_v49 = vpop.permute.xlu1 %1401 }
 0xa1b   : > { %1407 = vst.msk [vmem:[#allocation3 + $0x8] sm:$0xff] %vm1405_vm5, %v1402_v49 }
 0xa1e   : > { %v1633_v50 = vpop.permute.xlu1 %1632 }
 0xa1f   : > { %1638 = vst.msk [vmem:[#allocation3 + $0x8] sm:$0xff] %vm1636_vm6, %v1633_v50 }
 0xa20   : > { %v2946_v51 = vpop.eup %2945 }
 0xa21   : > { %v1754_v53 = vsel %vm956_vm3, %v2946_v51, 0.0 }
 0xa22   : > { %1755 = vadd.xlane.f32.xlu0 %v1754_v53 }
 0xa38   : > { %1763 = vrot.lane.b32.xlu0 %v3269_v43, %s3032_s30 }
 0xa3c   : > { %1630 = vrot.lane.b32.xlu0 %v1574_v17, %s3034_s8  ;;  %v2603_v17 = vld [vmem:[%s3582_s24] ss:$0 sm:$0xff]  ;;  %s3586_s24 = sld [smem:[#allocation16_spill]] (!%p2624_p6) }
 0xaa3   : > { %v1753_v54 = vpop.xlane.xlu0 %1752 }
 0xaa4   : > { %2947 = vrcp.f32 %v1753_v54 }
 0xaab   : > { %v1756_v57 = vpop.xlane.xlu0 %1755 }
 0xaac   : > { %2949 = vrcp.f32 %v1756_v57 }
 0xaaf   : > { %v1764_v58 = vpop.permute.xlu0 %1763 }
 0xab0   : > { %v1769_v59 = vsel %vm1081_vm4, %v1764_v58, 0 }
 0xab1   : > { %v2948_v60 = vpop.eup %2947  ;;  %2789 = vmatpush3.bf16.msra.mxu1 %v1769_v59  ;;  %v2907_v59 = vld [vmem:[%s3213_s25 + $0x38] sm:$0xff]  }
 0xab2   : > { %v1759_v61 = vmul.f32 %v2948_v60, %v2944_v28  ;;  %2800 = vmatprep.subr.bf16.mxu1 %v3020_v20  ;;  %v2607_v28 = vld [vmem:[%s797_s16] ss:$0 sm:$0xff]  ;;  %v2908_v60 = vld [vmem:[%s3213_s25 + $0x30] sm:$0xff]  }
 0xab3   : > { %v1631_v62 = vpop.permute.xlu0 %1630 }
 0xab4   : > { %1637 = vst.msk [vmem:[#allocation3] sm:$0xff] %vm1636_vm6, %v1631_v62  ;;  %v1761_v63 = vpack.c.bf16 %v1759_v61, %v1759_v61  ;;  %v2909_v61 = vld [vmem:[%s3213_s25 + $0x28] sm:$0xff]   ;;  %v2910_v62 = vld [vmem:[%s3213_s25 + $0x20] sm:$0xff]  }
 0xab6   : > { %2791 = vmatmul.mubr.msk.bf16.vlgmr.msra.gmra.mxu1 %vm956_vm3, %v1761_v63  ;;  %v2911_v63 = vld [vmem:[%s3213_s25 + $0x18] sm:$0xff]  }
 0xab7   : > { %2804 = vmatprep.mubr.msk.bf16.mxu1 %vm3021_vm2, %v3020_v20  ;;  %2801 = vmatpush3.bf16.msra.mxu1 %v2903_v1  ;;  %v2609_v1 = vld [vmem:[%s3583_s27] ss:$0 sm:$0xff] }
 0xab8   : > { %2802 = vmatprep.subr.bf16.mxu1 %v3020_v20 }
 0xab9   : > { %v2950_v43 = vpop.eup %2949 }
 0xaba   : > { %v1760_v55 = vmul.f32 %v2950_v43, %v2946_v51  ;;  %v2608_v51 = vld [vmem:[%s800_s21] ss:$0 sm:$0xff]  ;;  %v2912_v43 = vld [vmem:[%s3213_s25 + $0x10] sm:$0xff]  }
 0xabb   : > { %2803 = vmatpush3.bf16.msra.mxu1 %v2904_v2 }
 0xabc   : > { %v1762_v0 = vpack.c.bf16 %v1760_v55, %v1760_v55  ;;  %2816 = vmatprep.subr.bf16.mxu1 %v3020_v20  ;;  %v2913_v55 = vld [vmem:[%s3213_s25 + $0x8] sm:$0xff]  }
 0xabe   : > { %2797 = vmatmul.mubr.msk.bf16.vlgmr.msra.gmra.mxu0 %vm956_vm3, %v1762_v0  ;;  %v2914_v0 = vld [vmem:[%s3213_s25] sm:$0xff]  }
 0xabf   : > { %2812 = vmatprep.mubr.msk.bf16.mxu0 %vm3021_vm2, %v3020_v20  ;;  %2809 = vmatpush3.bf16.msra.mxu0 %v2905_v39 }
 0xac0   : > { %2810 = vmatprep.subr.bf16.mxu0 %v3020_v20 }
 0xac3   : > { %2811 = vmatpush3.bf16.msra.mxu0 %v2906_v40 }
 0xb76   : > { %v1805_v3 = vpop.f32.mrf.mxu1 }
 0xb77   : > { %1861 = vrot.lane.b32.xlu0 %v1805_v3, %s3035_s18 }
 0xb78   : > { %v2792_v4 = vpop.f32.mrf.mxu1 }
 0xb7a   : > { %v1808_v7 = vpop.f32.mrf.mxu1 }
 0xb7c   : > { %v2793_v8 = vpop.f32.mrf.mxu1 }
 0xb7e   : > { %v1853_v9 = vpop.f32.mrf.mxu0 }
 0xb7f   : > { %1863 = vrot.lane.b32.xlu1 %v1853_v9, %s3035_s18 }
 0xb80   : > { %v2798_v10 = vpop.f32.mrf.mxu0 }
 0xb82   : > { %v1856_v52 = vpop.f32.mrf.mxu0 }
 0xb84   : > { %v2799_v11 = vpop.f32.mrf.mxu0 }
 0xbe9   : > { %v1862_v12 = vpop.permute.xlu0 %1861 }
 0xbea   : > { %1868 = vst.msk [vmem:[#allocation3] sm:$0xff] %vm1867_vm7, %v1862_v12 }
 0xbf1   : > { %v1864_v13 = vpop.permute.xlu1 %1863  ;;  %v1870_v14 = vld [vmem:[#allocation3] sm:$0xff] }
 0xbf2   : > { %1869 = vst.msk [vmem:[#allocation3 + $0x8] sm:$0xff] %vm1867_vm7, %v1864_v13 }
 0xbf9   : > { %v1871_v15 = vld [vmem:[#allocation3 + $0x8] sm:$0xff] }
 0xbfa   : > { %v1872_v16 = vpack.c.bf16 %v1871_v15, %v1870_v14 }
 0xbfc   : > { %2805 = vmatmul.mubr.msk.bf16.vlgmr.msra.gmra.mxu1 %vm834_vm1, %v1872_v16 }
 0xbfd   : > { %2832 = vmatprep.mubr.msk.bf16.mxu1 %vm3021_vm2, %v3020_v20  ;;  %2817 = vmatpush3.bf16.msra.mxu1 %v2907_v59 }
 0xbfe   : > { %2818 = vmatprep.subr.bf16.mxu1 %v3020_v20 }
 0xc01   : > { %2819 = vmatpush3.bf16.msra.mxu1 %v2908_v60 }
 0xc02   : > { %2820 = vmatprep.subr.bf16.mxu1 %v3020_v20 }
 0xc05   : > { %2821 = vmatpush3.bf16.msra.mxu1 %v2909_v61 }
 0xc06   : > { %2822 = vmatprep.subr.bf16.mxu1 %v3020_v20 }
 0xc09   : > { %2823 = vmatpush3.bf16.msra.mxu1 %v2910_v62 }
 0xc0a   : > { %2824 = vmatprep.subr.bf16.mxu1 %v3020_v20 }
 0xc0d   : > { %2825 = vmatpush3.bf16.msra.mxu1 %v2911_v63 }
 0xc0e   : > { %2826 = vmatprep.subr.bf16.mxu1 %v3020_v20 }
 0xc11   : > { %2827 = vmatpush3.bf16.msra.mxu1 %v2912_v43 }
 0xc12   : > { %2828 = vmatprep.subr.bf16.mxu1 %v3020_v20 }
 0xc15   : > { %2829 = vmatpush3.bf16.msra.mxu1 %v2913_v55 }
 0xc16   : > { %2830 = vmatprep.subr.bf16.mxu1 %v3020_v20 }
 0xc19   : > { %2831 = vmatpush3.bf16.msra.mxu1 %v2914_v0 }
 0xcbc   : > { %v1933_v18 = vpop.f32.mrf.mxu1 }
 0xcbd   : > { %v1934_v19 = vadd.f32 %v2603_v17, %v1933_v18 }
 0xcbe   : > { %v2806_v21 = vpop.f32.mrf.mxu1 }
 0xcbf   : > { %v3435_v22 = vadd.f32 %v1934_v19, %v3229_v5 }
 0xcc0   : > { %v1936_v23 = vpop.f32.mrf.mxu1 }
 0xcc1   : > { %v1937_v24 = vadd.f32 %v2603_v17, %v1936_v23  ;;  %v1944_v25 = vsel %vm834_vm1, %v3435_v22, 0.0  ;;  %v2615_v23 = vld [vmem:[%s816_s28] ss:$0 sm:$0xff] }
 0xcc2   : > { %1945 = vadd.xlane.f32.xlu0 %v1944_v25  ;;  %v2807_v26 = vpop.f32.mrf.mxu1 }
 0xcc3   : > { %v3440_v27 = vadd.f32 %v1937_v24, %v3231_v6 }
 0xcc5   : > { %v1947_v29 = vsel %vm834_vm1, %v3440_v27, 0.0 }
 0xcc6   : > { %1948 = vadd.xlane.f32.xlu1 %v1947_v29 }
 0xd4b   : > { %v1946_v30 = vpop.xlane.xlu0 %1945 }
 0xd4c   : > { %v1950_v31 = vmul.f32 0.03125, %v1946_v30 }
 0xd4e   : > { %v1952_v5 = vsub.f32 %v3435_v22, %v1950_v31 }
 0xd4f   : > { %v1949_v33 = vpop.xlane.xlu1 %1948 }
 0xd50   : > { %v1951_v34 = vmul.f32 0.03125, %v1949_v33  ;;  %v1954_v35 = vmul.f32 %v1952_v5, %v1952_v5 }
 0xd52   : > { %v1953_v36 = vsub.f32 %v3440_v27, %v1951_v34  ;;  %v1956_v37 = vsel %vm834_vm1, %v1954_v35, 0.0 }
 0xd53   : > { %1957 = vadd.xlane.f32.xlu0 %v1956_v37 }
 0xd54   : > { %v1955_v38 = vmul.f32 %v1953_v36, %v1953_v36 }
 0xd56   : > { %v1959_v6 = vsel %vm834_vm1, %v1955_v38, 0.0 }
 0xd57   : > { %1960 = vadd.xlane.f32.xlu0 %v1959_v6 }
 0xddc   : > { %v1958_v41 = vpop.xlane.xlu0 %1957 }
 0xddd   : > { %v1962_v56 = vmul.f32 0.03125, %v1958_v41 }
 0xddf   : > { %v1964_v42 = vadd.f32 1e-05, %v1962_v56 }
 0xde0   : > { %v1961_v44 = vpop.xlane.xlu0 %1960 }
 0xde1   : > { %2951 = vrsqrt.f32 %v1964_v42  ;;  %v1963_v45 = vmul.f32 0.03125, %v1961_v44 }
 0xde3   : > { %v1965_v46 = vadd.f32 1e-05, %v1963_v45 }
 0xde5   : > { %2953 = vrsqrt.f32 %v1965_v46 }
 0xdee   : > { %v2952_v48 = vpop.eup %2951 }
 0xdef   : > { %v1968_v47 = vmul.f32 %v2952_v48, %v1952_v5 }
 0xdf1   : > { %v1976_v50 = vmul.f32 %v2607_v28, %v1968_v47 }
 0xdf2   : > { %v2954_v32 = vpop.eup %2953 }
 0xdf3   : > { %v1969_v49 = vmul.f32 %v2954_v32, %v1953_v36  ;;  %v1984_v54 = vadd.f32 %v2608_v51, %v1976_v50 }
 0xdf5   : > { %v1977_v53 = vmul.f32 %v2607_v28, %v1969_v49 }
 0xdf7   : > { %v1985_v57 = vadd.f32 %v2608_v51, %v1977_v53 }
 0xdf9   : > { %v1986_v58 = vpack.c.bf16 %v1985_v57, %v1984_v54 }
 0xdfb   : > { %2813 = vmatmul.mubr.msk.bf16.vlgmr.msra.gmra.mxu0 %vm834_vm1, %v1986_v58 }
 0xebb   : > { %v2047_v2 = vpop.f32.mrf.mxu0 }
 0xebc   : > { %v2048_v3 = vadd.f32 %v2609_v1, %v2047_v2 }
 0xebd   : > { %v2814_v4 = vpop.f32.mrf.mxu0 }
 0xebe   : > { %v2613_v7 = vmul.f32 -1.702, %v2048_v3 }
 0xebf   : > { %v2050_v8 = vpop.f32.mrf.mxu0 }
 0xec0   : > { %v2058_v9 = vmul.f32 1.442695, %v2613_v7  ;;  %v2051_v10 = vadd.f32 %v2609_v1, %v2050_v8 }
 0xec1   : > { %v2815_v52 = vpop.f32.mrf.mxu0 }
 0xec2   : > { %2955 = vpow2.f32 %v2058_v9  ;;  %v2614_v11 = vmul.f32 -1.702, %v2051_v10 }
 0xec4   : > { %v2060_v12 = vmul.f32 1.442695, %v2614_v11 }
 0xec6   : > { %2957 = vpow2.f32 %v2060_v12 }
 0xecf   : > { %v2956_v20 = vpop.eup %2955 }
 0xed0   : > { %v2062_v13 = vadd.f32 1.0, %v2956_v20 }
 0xed2   : > { %2959 = vrcp.f32 %v2062_v13 }
 0xed3   : > { %v2958_v14 = vpop.eup %2957 }
 0xed4   : > { %v2063_v15 = vadd.f32 1.0, %v2958_v14 }
 0xed6   : > { %2961 = vrcp.f32 %v2063_v15 }
 0xedf   : > { %v2960_v16 = vpop.eup %2959 }
 0xee0   : > { %v2068_v18 = vmul.f32 %v2960_v16, %v2048_v3 }
 0xee3   : > { %v2962_v17 = vpop.eup %2961 }
 0xee4   : > { %v2069_v19 = vmul.f32 %v2962_v17, %v2051_v10 }
 0xee6   : > { %v2070_v21 = vpack.c.bf16 %v2069_v19, %v2068_v18 }
 0xee8   : > { %2833 = vmatmul.mubr.bf16.vlgmr.msra.gmra.mxu1 %v2070_v21 }
 0xfa8   : > { %v2176_v24 = vpop.f32.mrf.mxu1 }
 0xfa9   : > { %v2177_v25 = vadd.f32 %v2615_v23, %v2176_v24 }
 0xfaa   : > { %v2834_v26 = vpop.f32.mrf.mxu1 }
 0xfab   : > { %v2183_v29 = vadd.f32 %v2177_v25, %v3435_v22 }
 0xfac   : > { %v2179_v30 = vpop.f32.mrf.mxu1 }
 0xfad   : > { %2185 = vst.msk [vmem:[#allocation2] sm:$0xff] %vm834_vm1, %v2183_v29  ;;  %v2180_v31 = vadd.f32 %v2615_v23, %v2179_v30  ;;  %2190 = sbr.rel (%p2624_p6) target bundleno = 4854 (0x12f6), region = 104 }
 0xfae   : > { %v2835_v5 = vpop.f32.mrf.mxu1 }
 0xfaf   : > { %v2184_v33 = vadd.f32 %v2180_v31, %v3440_v27 }
 0xfb1   : > { %2186 = vst.msk [vmem:[#allocation2 + $0x8] sm:$0xff] %vm834_vm1, %v2184_v33 }
 0xfb2   : > { %v2191_v34 = vlaneseq  ;;  %v3036_v35 = vmov 0   ;;  %v3037_v36 = vmov 0.0   ;;  %v2194_v22 = vld [vmem:[%s3584_s19] sm:$0x3]  ;;  %vm3038_vm8 = vmmov 0   ;;  %v2964_v28 = vld [vmem:[%s3585_s17 + $0x8] sm:$0xff]  }
 0xfb3   : > { %2963 = vset.pattern.permute.xlu0 %v3036_v35  ;;  %2836 = vmatprep.subr.mxu0 %v3037_v36  ;;  %vm2204_vm9 = vcmask 130048   ;;  %vm2280_vm11 = vcmask 254976   ;;  %v2965_v32 = vld [vmem:[%s3585_s17] sm:$0xff]  }
 0xfb4   : > { %v2192_v37 = vshrl.u32 %v2191_v34, 7  ;;  %2837 = vmatpush3.msra.mxu0 %v2184_v33  ;;  %2843 = vmatprep.subr.bf16.mxu1 %v3037_v36  ;;  %v2197_v6 = vand.u32 127, %v2191_v34  ;;  %v2627_v54 = vld [vmem:[%s3586_s24] ss:$0 sm:$0xff] }
 0xfb5   : > { %2838 = vmatprep.subr.mxu0 %v3037_v36  ;;  %2840 = vmatprep.mubr.msk.f32.mxu0 %vm3038_vm8, %v3037_v36  ;;  %v2628_v58 = vld [vmem:[%s3587_s6] ss:$0 sm:$0xff] }
 0xfb6   : > { %v2193_v38 = vmul.u32 8, %v2192_v37  ;;  %2839 = vmatpush3.msra.mxu0 %v2183_v29  ;;  %2847 = vmatprep.mubr.msk.bf16.mxu1 %vm3038_vm8, %v3037_v36 }
 0xfb7   : > { %2844 = vmatpush3.bf16.msra.mxu1 %v2964_v28 }
 0xfb8   : > { %v2195_v27 = vadd.s32 %v2194_v22, %v2193_v38  ;;  %2845 = vmatprep.subr.bf16.mxu1 %v3037_v36 }
 0xfba   : > { %2199 = vperm.xlu0 %2963, %v2195_v27  }
 0xfbb   : > { %2846 = vmatpush3.bf16.msra.mxu1 %v2965_v32 }
0x1035   : > { %v2200_v39 = vpop.permute.xlu0 %2199 }
0x1036   : > { %vm2201_vm10 = vcmp.eq.s32.totalorder %v2197_v6, %v2200_v39 }
0x1037   : > { %v2625_v40 = vsel %vm2201_vm10, 1.0, %v3037_v36 }
0x1038   : > { %2841 = vmatmul.mubr.msk.f32.vlgmr.msra.gmra.mxu0 %vm2204_vm9, %v2625_v40 }
0x10f8   : > { %v2274_v41 = vpop.f32.mrf.mxu0 }
0x10f9   : > { %v2281_v56 = vsel %vm2280_vm11, %v2274_v41, 0.0 }
0x10fa   : > { %2282 = vadd.xlane.f32.xlu0 %v2281_v56  ;;  %v2842_v42 = vpop.f32.mrf.mxu0 }
0x1183   : > { %v2283_v44 = vpop.xlane.xlu0 %2282 }
0x1184   : > { %v2284_v45 = vmul.f32 0.03125, %v2283_v44 }
0x1186   : > { %v2285_v46 = vsub.f32 %v2274_v41, %v2284_v45 }
0x1188   : > { %v2286_v48 = vmul.f32 %v2285_v46, %v2285_v46 }
0x118a   : > { %v2287_v47 = vsel %vm2280_vm11, %v2286_v48, 0.0 }
0x118b   : > { %2288 = vadd.xlane.f32.xlu1 %v2287_v47 }
0x1214   : > { %v2289_v49 = vpop.xlane.xlu1 %2288 }
0x1215   : > { %v2290_v50 = vmul.f32 0.03125, %v2289_v49 }
0x1217   : > { %v2291_v51 = vadd.f32 1e-05, %v2290_v50 }
0x1219   : > { %2966 = vrsqrt.f32 %v2291_v51 }
0x1226   : > { %v2967_v53 = vpop.eup %2966 }
0x1227   : > { %v2293_v57 = vmul.f32 %v2967_v53, %v2285_v46 }
0x1229   : > { %v2300_v59 = vmul.f32 %v2627_v54, %v2293_v57 }
0x122b   : > { %v2307_v60 = vadd.f32 %v2628_v58, %v2300_v59 }
0x122d   : > { %v2308_v61 = vpack.c.bf16 %v2307_v60, %v2307_v60 }
0x122f   : > { %2848 = vmatmul.mubr.msk.bf16.vlgmr.msra.gmra.mxu1 %vm834_vm1, %v2308_v61 }
0x12ef   : > { %v2362_v62 = vpop.f32.mrf.mxu1 }
0x12f0   : > { %2368 = vst.msk [vmem:[#allocation4] sm:$0x3] %vm2280_vm11, %v2362_v62 }
0x12f1   : > { %v2849_v63 = vpop.f32.mrf.mxu1 }
0x12f3   : > { %v2365_v43 = vpop.f32.mrf.mxu1 }
0x12f5   : > { %v2850_v55 = vpop.f32.mrf.mxu1 }
0x12f6 PF: > { %s3588_s29 = sld [smem:[#allocation8_spill]]  ;;  %s3039_s27 = smov [#allocation4]  }
0x12f7   : > { %s2378_s25 = sshll.u32 %s3039_s27, 4  ;;  %s2379_s25 = int_to_ptr.vmem [resolvable:$true] %s2378_s25 }
0x12f8   : > { %s2968_s23 = scalar_lea.vmem %s2379_s25, 32  ;;  %p2975_p11 = scmp.lt.s32.totalorder %s2379_s25, %s2379_s25 }
0x12f9   : > { %p2969_p8 = scmp.ne.s32.totalorder %s2379_s25, %s2968_s23  ;;  %p2976_p12 = scmp.lt.s32.totalorder %s2968_s23, %s2968_s23 }
0x12fb   : > { %p2977_p13 = por %p2976_p12, %p2975_p11 }
0x12fc   : > { %s3589_s16 = sadd.s32 4294967295, %s3588_s29  }
0x12fd   : > { %p3513_p7 = scmp.eq.s32.totalorder %s3589_s16, 1 }
0x12ff   : > { %p2970_p9 = pnand %p2969_p8, %p3513_p7 }
0x1301   : > { %p2971_p10 = pneg %p2970_p9 }
0x1303   : > { %p2978_p0 = pnand %p2977_p13, %p2971_p10 }
0x1305   : > { %2981 = shalt.err (!%p2978_p0)
}
0x1306   : > { %s3591_s19 = sld [smem:[#allocation19_spill]] }
0x130c   : > { %2852 = dma.vmem_to_hbm [thread:$0]  (%p3513_p7), %s2379_s25, 32, %s3591_s19, [#allocation5]  }
0x130d   : > { %3005 = dma.done.wait (%p3513_p7), [#allocation5], 32  }
0x130e   : > { %3007 = vsyncadd (%p3513_p7), [#allocation5], 4294967264 }
0x130f PF: > { %s3592_s0 = sld [smem:[#allocation8_spill]] }
0x1310   : > { %s3594_s30 = sld [smem:[#allocation9_spill]] }
0x1315   : > { %s30_s20 = sadd.s32 1, %s3592_s0   ;;  %s3593_s0 = sld [smem:[#allocation7_spill]] }
0x1316   : > { %p27_p1 = scmp.ge.s32.totalorder %s30_s20, 4  }
0x1318   :  { %29 = sbr.rel (!%p27_p1) target bundleno = 13 (0xd), region = 171 }
0x131d   :  { %2391 = vsyncpa [#allocation5], 1 }
0x131e   :  { %2393 = vsyncpa [#allocation5 + $0x1], 1 }

</bundles_post_ra>
